<compile_context>
chip_gen: v7x
topology: tpu7x:2x2x1
jax: 0.10.0
libtpu: 0.0.40
codegen_flags: <defaults>
</compile_context>

<pallas_src>
import functools

import numpy as np
import jax
import jax.numpy as jnp
from jax.experimental import pallas as pl
from jax.experimental.pallas import tpu as pltpu

METADATA = (4, 4, 4, 4)                                      # channels per l, l = 0..3
N_CHANNELS = sum(METADATA)                                   # 16
REP_LEN = sum((2 * l + 1) * m for l, m in enumerate(METADATA))  # 64
FOLD = 4
L_FOLD = REP_LEN // FOLD                                     # 16
TWOB = L_FOLD * L_FOLD * FOLD                                # 1024 (lane-dense 2-body width)

GAUGE_EPS = 1e-2     # RepNorm1d gauge divisor eps
BN_EPS = 1e-5        # torch BatchNorm1d default eps

# packed-parameter slab row offsets
_P128_ROWS = 136      # rows 0:32 blockdiag(poolT,poolT), 32:96 mbig, 96:112 w1^T,
                      # 112:128 w2^T, 128 b1, 129 b2, 130:134 wg^T, 134 bg, 135 l0
_P1K_ROWS = 80        # rows 0:64 E2, 64:71 coef, 71:75 selT (all 1024-lane wide)
_COEF_ROW0 = 64
_SELT_ROW0 = 71


# ----------------------------------------------------------------------------
# Host-side constant construction (rep layout, selection matrices, slabs)
# ----------------------------------------------------------------------------
def _rep_layout():
    """Per rep-axis entry: (l, global channel id); l-major, m-mid, chan-minor."""
    ls, chans = [], []
    off = 0
    for l, nc in enumerate(METADATA):
        for _m in range(2 * l + 1):
            for c in range(nc):
                ls.append(l)
                chans.append(off + c)
        off += nc
    return np.asarray(ls), np.asarray(chans)


def build_static_params(ielin_ws, w1, b1, w2, b2, wt, wg, bg):
    """All weights use the torch convention: Linear weight (out, in), bias (out,)."""
    _, chans = _rep_layout()
    pool = np.zeros((REP_LEN, N_CHANNELS), np.float32)
    pool[np.arange(REP_LEN), chans] = 1.0                    # rep-entry -> channel
    l0mask = np.zeros((N_CHANNELS,), np.float32)
    l0mask[: METADATA[0]] = 1.0                              # l == 0 channels

    # IELin as one block-diagonal matmul: per-(l,m) block is W_l.T
    mbig = np.zeros((REP_LEN, REP_LEN), np.float32)
    base = 0
    for l, nc in enumerate(METADATA):
        wl = np.asarray(ielin_ws[l], np.float32)             # (out, in)
        for _m in range(2 * l + 1):
            mbig[base:base + nc, base:base + nc] = wl.T
            base += nc

    # --- 128-lane constant parameter slab ------------------------------------
    p128 = np.zeros((_P128_ROWS, 128), np.float32)
    poolT = pool.T                                           # (16, 64)
    p128[0:N_CHANNELS, 0:REP_LEN] = poolT                    # blockdiag(poolT, poolT)
    p128[N_CHANNELS:2 * N_CHANNELS, REP_LEN:2 * REP_LEN] = poolT
    p128[32:96, 0:REP_LEN] = mbig
    p128[96:112, 0:N_CHANNELS] = np.asarray(w1, np.float32).T    # kernel does x @ W.T
    p128[112:128, 0:N_CHANNELS] = np.asarray(w2, np.float32).T
    p128[128, 0:N_CHANNELS] = np.asarray(b1, np.float32).reshape(-1)
    p128[129, 0:N_CHANNELS] = np.asarray(b2, np.float32).reshape(-1)
    p128[130:134, 0:FOLD] = np.asarray(wg, np.float32).T
    p128[134, 0:FOLD] = np.asarray(bg, np.float32).reshape(-1)
    p128[135, 0:N_CHANNELS] = l0mask

    # --- 1024-lane slab: E2 selection matrix + roll coefs + channel masks ----
    s = np.arange(TWOB)
    i_idx = s // (L_FOLD * FOLD)          # i
    j_idx = (s // FOLD) % L_FOLD          # j  (unused below, kept for clarity)
    c_idx = s % FOLD                      # fold channel
    del j_idx
    e2 = np.zeros((REP_LEN, TWOB), np.float32)
    e2[i_idx * FOLD + c_idx, s] = 1.0     # G2[b,s] = fold(x1_new)[b, i(s), c(s)]
    selT = np.zeros((FOLD, TWOB), np.float32)
    selT[c_idx, s] = 1.0                  # per-channel lane mask

    wt_np = np.asarray(wt, np.float32)    # (out, in)
    # coef row for roll shift k is nonzero only where c(s)-k stays inside the
    # 4-wide channel group, so circular-wraparound lanes of each roll are
    # always multiplied by 0 (this is what makes shift = k % TWOB safe).
    coef = np.zeros((7, TWOB), np.float32)
    for idx, k in enumerate(range(-3, 4)):
        ci = c_idx - k
        valid = (ci >= 0) & (ci < FOLD)
        coef[idx, valid] = wt_np[c_idx[valid], ci[valid]]

    p1k = np.zeros((_P1K_ROWS, TWOB), np.float32)
    p1k[0:REP_LEN, :] = e2
    p1k[_COEF_ROW0:_COEF_ROW0 + 7, :] = coef
    p1k[_SELT_ROW0:_SELT_ROW0 + FOLD, :] = selT

    slabs = dict(p128=jnp.asarray(p128), p1k=jnp.asarray(p1k))
    ref_consts = dict(pool=jnp.asarray(pool), l0=jnp.asarray(l0mask),
                      mbig=jnp.asarray(mbig))
    return slabs, ref_consts


# ----------------------------------------------------------------------------
# Shared in-kernel helper: per-row SO(3) invariant from x1 and the p128 slab
# ----------------------------------------------------------------------------
def _invariant(x1, p128_ref):
    """l==0 channels -> value, l>0 channels -> L2 norm over m (per channel)."""
    f32 = jnp.float32
    cat = jnp.concatenate([x1 * x1, x1], axis=1)              # (bb, 128)
    pt2 = p128_ref[0:2 * N_CHANNELS, :]                       # blockdiag(poolT,poolT)
    # contract against the 128-axis of the (32,128) slab: one MXU matmul
    both = jax.lax.dot_general(cat, pt2, (((1,), (1,)), ((), ())),
                               preferred_element_type=f32)    # (bb, 32)
    sumsq = both[:, 0:N_CHANNELS]
    pick = both[:, N_CHANNELS:2 * N_CHANNELS]
    l0 = p128_ref[135:136, 0:N_CHANNELS]
    return jnp.where(l0 > 0.5, pick, jnp.sqrt(sumsq))


# ----------------------------------------------------------------------------
# Kernel 1: batch sum / sum-of-squares of the invariant (grid reduction)
# ----------------------------------------------------------------------------
def _stats_kernel(x1_ref, p128_ref, stat_ref):
    # output-resident accumulator across the (arbitrary) batch-block axis:
    # row 0, lanes 0:16 = sum_b inv ; lanes 16:32 = sum_b inv^2
    @pl.when(pl.program_id(0) == 0)
    def _():
        stat_ref[...] = jnp.zeros_like(stat_ref)

    inv = _invariant(x1_ref[...], p128_ref)                   # (bb, 16)
    part = jnp.concatenate([inv, inv * inv], axis=1)          # (bb, 32)
    psum = jnp.sum(part, axis=0, keepdims=True)               # (1, 32)
    stat_ref[0:1, 0:2 * N_CHANNELS] = stat_ref[0:1, 0:2 * N_CHANNELS] + psum


# ----------------------------------------------------------------------------
# Kernel 2: main fused forward (per batch block, fully independent)
# ----------------------------------------------------------------------------
def _mini2d_kernel(x1_ref, x2_ref, p128_ref, p1k_ref, bn_ref,
                   out1_ref, out2_ref):
    f32 = jnp.float32
    x1 = x1_ref[...]                                          # (bb, 64)
    x2f = x2_ref[...]                                         # (bb, 1024) lane-dense

    # ---- static views into the packed parameter slabs ----------------------
    pt2 = p128_ref[0:2 * N_CHANNELS, :]                       # blockdiag(poolT, poolT)
    mbig = p128_ref[32:96, 0:REP_LEN]                         # (64, 64)
    w1 = p128_ref[96:112, 0:N_CHANNELS]
    w2 = p128_ref[112:128, 0:N_CHANNELS]
    b1 = p128_ref[128:129, 0:N_CHANNELS]
    b2 = p128_ref[129:130, 0:N_CHANNELS]
    wgT = p128_ref[130:134, 0:FOLD]                           # (4, 4) = wg^T
    bg = p128_ref[134:135, 0:FOLD]
    bn_s = bn_ref[0:1, 0:N_CHANNELS]                          # folded BN scale
    bn_b = bn_ref[1:2, 0:N_CHANNELS]                          # folded BN shift
    e2 = p1k_ref[0:REP_LEN, :]                                # (64, 1024)
    sel = [p1k_ref[_SELT_ROW0 + c:_SELT_ROW0 + c + 1, :]      # 4 x (1, 1024)
           for c in range(FOLD)]

    # ---- RepNorm1d: invariant (recomputed, no HBM roundtrip) + BN + gauge ---
    inv = _invariant(x1, p128_ref)                            # (bb, 16)
    n = inv * bn_s + bn_b
    # TODO(synk): torch_gauge RepNorm1d gauge divisor approximated as
    # 1 / (|invariant| + eps); pl.reciprocal(approx=True) uses the EUP slot.
    g_scale = pl.reciprocal(jnp.abs(inv) + GAUGE_EPS, approx=True)   # (bb, 16)

    # ---- onebody MLP: Linear -> Swish -> Linear -----------------------------
    h = jnp.dot(n, w1, preferred_element_type=f32) + b1
    h = h * jax.nn.sigmoid(h)
    n2 = jnp.dot(h, w2, preferred_element_type=f32) + b2      # (bb, 16)

    # ---- stacked poolT expansion: [g_scale | n2] @ blockdiag(poolT, poolT) --
    gn = jnp.concatenate([g_scale, n2], axis=1)               # (bb, 32)
    expd = jnp.dot(gn, pt2, preferred_element_type=f32)       # (bb, 128)
    gexp = expd[:, 0:REP_LEN]
    nexp = expd[:, REP_LEN:2 * REP_LEN]

    # ---- onebody IELin (block-diag matmul) + scalar_mul ---------------------
    gauge = x1 * gexp
    x1_new = jnp.dot(gauge, mbig, preferred_element_type=f32) * nexp
    out1_ref[...] = x1_new

    # ---- two-body invariant a0: only E2 stays on the MXU --------------------
    # G2[b,s] = fold(x1_new)[b, i(s), c(s)]  (selection matmul, K=64)
    g2 = jnp.dot(x1_new, e2, preferred_element_type=f32)      # (bb, 1024)
    # G1[b,s] = fold(x1_new)[b, j(s), c(s)] = x1_new[b, s mod 64]: tile the 64
    # lanes 16x with lane concats (one 64-lane merge, then vreg-aligned tiles).
    g1h = jnp.concatenate([x1_new, x1_new], axis=1)           # (bb, 128)
    g1 = jnp.concatenate([g1h] * (TWOB // 128), axis=1)       # (bb, 1024)
    prod = (x2f * g2) * g1                                    # (bb, 1024)

    # a0[:, c] = sum_s selT[c,s] * prod[:, s]  (4 masked cross-lane reductions)
    a0 = jnp.concatenate(
        [jnp.sum(prod * sel[c], axis=1, keepdims=True) for c in range(FOLD)],
        axis=1)                                               # (bb, 4)

    # ---- twobody_gate: Linear(4,4)+bias as lane-broadcast FMAs, then Swish --
    a1 = bg
    for c in range(FOLD):
        a1 = a1 + a0[:, c:c + 1] * wgT[c:c + 1, :]            # (bb, 4)
    a = a1 * jax.nn.sigmoid(a1)

    # gate broadcast to 1024 lanes: 4 lane-broadcast FMAs (no MXU)
    abig = a[:, 0:1] * sel[0]
    for c in range(1, FOLD):
        abig = abig + a[:, c:c + 1] * sel[c]                  # (bb, 1024)

    # ---- twobody_linear (4x4, no bias) as coef-masked lane rolls ------------
    # y[b,s] = sum_k coef_k[s] * x2f[b, s-k]; roll wraparound lanes are zeroed
    # by the coef mask (invalid c(s)-k entries), so shift = k % TWOB is safe.
    y = x2f * p1k_ref[_COEF_ROW0 + 3:_COEF_ROW0 + 4, :]       # k = 0
    for idx, k in ((0, -3), (1, -2), (2, -1), (4, 1), (5, 2), (6, 3)):
        shifted = pltpu.roll(x2f, shift=k % TWOB, axis=1)
        y = y + shifted * p1k_ref[_COEF_ROW0 + idx:_COEF_ROW0 + idx + 1, :]

    out2_ref[...] = y * abig                                  # fused gate, dense store


# ----------------------------------------------------------------------------
# Wrapper
# ----------------------------------------------------------------------------
def _default_block_b(batch, max_bb=256):
    """Largest 8-aligned divisor of `batch` that keeps the grid pipelined:
    prefer an even grid count >= 4 (2 v7x TensorCores x >= 2 steps each), then
    any grid count >= 2; fall back to a single block only when unavoidable."""
    if batch % 8 != 0:
        return batch
    divs = [d for d in range(8, min(batch, max_bb) + 1, 8) if batch % d == 0]
    if not divs:
        return batch
    for good in (lambda steps: steps >= 4 and steps % 2 == 0,
                 lambda steps: steps >= 2):
        ok = [d for d in divs if good(batch // d)]
        if ok:
            return max(ok)
    return max(divs)


@functools.partial(jax.jit, static_argnames=("block_b",))
def mini2d_so3_forward(x1d, x2d, p128c, p1k, gamma, beta, block_b=None):
    B = x1d.shape[0]
    bb = block_b if block_b is not None else _default_block_b(B)
    if B % bb != 0:
        raise ValueError(f"block_b={bb} must divide batch={B}")
    grid = (B // bb,)

    # ---- pass 1: batch sum / sum-of-squares of the invariant ----------------
    # (grid-reduction accumulator; only 2x16 scalars ever touch HBM)
    stats = pl.pallas_call(
        _stats_kernel,
        out_shape=jax.ShapeDtypeStruct((8, 128), jnp.float32),
        grid=grid,
        in_specs=[pl.BlockSpec((bb, REP_LEN), lambda i: (i, 0)),
                  pl.BlockSpec((_P128_ROWS, 128), lambda i: (0, 0))],
        out_specs=pl.BlockSpec((8, 128), lambda i: (0, 0)),
        compiler_params=pltpu.CompilerParams(
            dimension_semantics=("arbitrary",)),
    )(x1d, p128c)

    # ---- the only cross-batch coupling: BatchNorm batch statistics ----------
    # (training-mode batch stats; running-stat update side effect not emitted)
    s1 = stats[0, 0:N_CHANNELS]
    s2 = stats[0, N_CHANNELS:2 * N_CHANNELS]
    mu = s1 / B
    var = jnp.maximum(s2 / B - mu * mu, 0.0)
    bn_scale = gamma * jax.lax.rsqrt(var + BN_EPS)
    bn_shift = beta - mu * bn_scale
    bn = jnp.zeros((8, 128), jnp.float32)
    bn = bn.at[0, :N_CHANNELS].set(bn_scale)
    bn = bn.at[1, :N_CHANNELS].set(bn_shift)

    # lane-dense two-body slab (free row-major reshape in the wrapper)
    x2f = x2d.reshape(B, TWOB)

    flops = int(B) * (2 * (128 * 32 + 2 * 16 * 16 + 32 * 128 + 64 * 64
                           + REP_LEN * TWOB) + 40 * TWOB)
    cost = pl.CostEstimate(
        flops=flops,
        transcendentals=int(B) * 52,
        bytes_accessed=int(B) * 4 * 2 * (REP_LEN + TWOB)
        + 4 * (_P128_ROWS * 128 + _P1K_ROWS * TWOB + 8 * 128),
    )

    out1, out2f = pl.pallas_call(
        _mini2d_kernel,
        out_shape=(jax.ShapeDtypeStruct((B, REP_LEN), jnp.float32),
                   jax.ShapeDtypeStruct((B, TWOB), jnp.float32)),
        grid=grid,
        in_specs=[pl.BlockSpec((bb, REP_LEN), lambda i: (i, 0)),
                  pl.BlockSpec((bb, TWOB), lambda i: (i, 0)),
                  # constant slabs / folded BN rows (constant index_map).
                  # pl.Buffered(1) would save ~0.4 MiB more VMEM; skipped as
                  # negligible at these block sizes.
                  pl.BlockSpec((_P128_ROWS, 128), lambda i: (0, 0)),
                  pl.BlockSpec((_P1K_ROWS, TWOB), lambda i: (0, 0)),
                  pl.BlockSpec((8, 128), lambda i: (0, 0))],
        out_specs=(pl.BlockSpec((bb, REP_LEN), lambda i: (i, 0)),
                   pl.BlockSpec((bb, TWOB), lambda i: (i, 0))),
        compiler_params=pltpu.CompilerParams(
            dimension_semantics=("parallel",),
            vmem_limit_bytes=48 * 1024 * 1024),
        cost_estimate=cost,
        # TODO(synk): for production (x2d dead after the call) alias x2f->out2
        # via input_output_aliases; bf16 HBM storage of x2f/out2 is a v5e/v6e
        # bandwidth win but is skipped to preserve the torch forward numerics.
    )(x1d, x2f, p128c, p1k, bn)

    return out1, out2f.reshape(x2d.shape)


# ----------------------------------------------------------------------------
# Pure-JAX reference in the original layout (cross-checks the lane-dense math)
# ----------------------------------------------------------------------------
def reference_forward(x1d, x2d, gamma, beta, w1, b1, w2, b2, wt, wg, bg, consts):
    pool, l0, mbig = consts["pool"], consts["l0"], consts["mbig"]
    sumsq = (x1d * x1d) @ pool
    pick = x1d @ pool
    inv = jnp.where(l0[None, :] > 0.5, pick, jnp.sqrt(sumsq))
    mu = inv.mean(axis=0)
    var = jnp.mean(jnp.square(inv - mu), axis=0)
    n = (inv - mu) * jax.lax.rsqrt(var + BN_EPS) * gamma + beta
    gauge = x1d * ((1.0 / (jnp.abs(inv) + GAUGE_EPS)) @ pool.T)
    h = n @ w1.T + b1
    h = h * jax.nn.sigmoid(h)
    n2 = h @ w2.T + b2
    x1_new = (gauge @ mbig) * (n2 @ pool.T)
    B = x1d.shape[0]
    f = x1_new.reshape(B, L_FOLD, FOLD)
    t = jnp.einsum("bijc,bjc->bic", x2d, f)
    a0 = jnp.einsum("bic,bic->bc", t, f)
    a1 = a0 @ wg.T + bg
    a = a1 * jax.nn.sigmoid(a1)
    y = jnp.einsum("bijc,oc->bijo", x2d, wt)
    return x1_new, y * a[:, None, None, :]


if __name__ == "__main__":
    B = 32
    key = jax.random.PRNGKey(0)
    k_x1, k_x2, k_p = jax.random.split(key, 3)
    x1d = jax.random.normal(k_x1, (B, REP_LEN), jnp.float32)
    x2d = jax.random.normal(k_x2, (B, L_FOLD, L_FOLD, FOLD), jnp.float32)

    ks = jax.random.split(k_p, 13)
    # torch conventions: Linear weight (out, in), bias (out,)
    w1 = 0.2 * jax.random.normal(ks[0], (N_CHANNELS, N_CHANNELS), jnp.float32)
    b1 = 0.1 * jax.random.normal(ks[1], (N_CHANNELS,), jnp.float32)
    w2 = 0.2 * jax.random.normal(ks[2], (N_CHANNELS, N_CHANNELS), jnp.float32)
    b2 = 0.1 * jax.random.normal(ks[3], (N_CHANNELS,), jnp.float32)
    gamma = 1.0 + 0.1 * jax.random.normal(ks[4], (N_CHANNELS,), jnp.float32)
    beta = 0.1 * jax.random.normal(ks[5], (N_CHANNELS,), jnp.float32)
    ielin_ws = [0.3 * jax.random.normal(ks[6 + l], (m, m), jnp.float32)
                for l, m in enumerate(METADATA)]
    wt = 0.3 * jax.random.normal(ks[10], (FOLD, FOLD), jnp.float32)
    wg = 0.3 * jax.random.normal(ks[11], (FOLD, FOLD), jnp.float32)
    bg = 0.1 * jax.random.normal(ks[12], (FOLD,), jnp.float32)

    slabs, ref_consts = build_static_params(ielin_ws, w1, b1, w2, b2, wt, wg, bg)

    # default block_b -> bb=8, grid=(4,): even, >= 4 steps (both v7x cores busy
    # and pipelined) and validates the stats-reduction / hoisted-BN tiling.
    out1, out2 = mini2d_so3_forward(x1d, x2d, slabs["p128"], slabs["p1k"],
                                    gamma, beta)
    jax.block_until_ready((out1, out2))

    ref1, ref2 = reference_forward(x1d, x2d, gamma, beta, w1, b1, w2, b2,
                                   wt, wg, bg, ref_consts)
    assert out1.shape == (B, REP_LEN)
    assert out2.shape == (B, L_FOLD, L_FOLD, FOLD)
    # 5e-3 tolerance accommodates the approximate (EUP) reciprocal used for
    # the gauge divisor; layout / selection / roll bugs would be O(1) errors.
    assert jnp.allclose(out1, ref1, atol=5e-3, rtol=5e-3), \
        float(jnp.max(jnp.abs(out1 - ref1)))
    assert jnp.allclose(out2, ref2, atol=5e-3, rtol=5e-3), \
        float(jnp.max(jnp.abs(out2 - ref2)))

    print("KERNEL_OK")
</pallas_src>

<mosaic_0001>
module attributes {stable_mosaic.version = 11 : i64} {
  func.func @_stats_kernel(%arg0: i32, %arg1: memref<8x64xf32, #tpu.memory_space<vmem>>, %arg2: memref<136x128xf32, #tpu.memory_space<vmem>>, %arg3: memref<8x128xf32, #tpu.memory_space<vmem>>) attributes {dimension_semantics = [#tpu.dimension_semantics<arbitrary>], iteration_bounds = array<i64: 4>, scalar_prefetch = 0 : i64, scratch_operands = 0 : i64, tpu.core_type = #tpu.core_type<tc>, window_params = [{transform_indices = @transform_0, window_bounds = array<i64: 8, 64>}, {pipeline_mode = #tpu.pipeline_mode<synchronous>, transform_indices = @transform_1, window_bounds = array<i64: 136, 128>}, {pipeline_mode = #tpu.pipeline_mode<synchronous>, transform_indices = @transform_2, window_bounds = array<i64: 8, 128>}]} {
    %c0_i32 = arith.constant 0 : i32
    %0 = arith.cmpi eq, %arg0, %c0_i32 : i32
    %1 = arith.extui %0 : i1 to i32
    %c0_i32_0 = arith.constant 0 : i32
    %2 = arith.cmpi ne, %1, %c0_i32_0 : i32
    scf.if %2 {
      %cst_11 = arith.constant 0.000000e+00 : f32
      %24 = vector.broadcast %cst_11 : f32 to vector<8x128xf32>
      %c0_12 = arith.constant 0 : index
      %c0_13 = arith.constant 0 : index
      %25 = vector.load %arg3[%c0_12, %c0_13] : memref<8x128xf32, #tpu.memory_space<vmem>>, vector<8x128xf32>
      tpu.vector_store %arg3[%c0_12, %c0_13], %24 {strides = array<i32>} : memref<8x128xf32, #tpu.memory_space<vmem>>, vector<8x128xf32>,
    } else {
    }
    %c0 = arith.constant 0 : index
    %c0_1 = arith.constant 0 : index
    %3 = vector.load %arg1[%c0, %c0_1] : memref<8x64xf32, #tpu.memory_space<vmem>>, vector<8x64xf32>
    %4 = arith.mulf %3, %3 : vector<8x64xf32>
    %5 = tpu.concatenate %4, %3 in 1 : vector<8x64xf32>, vector<8x64xf32> -> vector<8x128xf32>
    %c0_2 = arith.constant 0 : index
    %c0_3 = arith.constant 0 : index
    %6 = vector.load %arg2[%c0_2, %c0_3] : memref<136x128xf32, #tpu.memory_space<vmem>>, vector<32x128xf32>
    %cst = arith.constant dense<0.000000e+00> : vector<8x32xf32>
    %7 = tpu.matmul %5, %6, %cst {dimension_numbers = #tpu.dot_dimension_numbers<[1], [1], [0], [0], [0, 0, 1, 0], [], []>} : vector<8x128xf32>, vector<32x128xf32>, vector<8x32xf32> -> vector<8x32xf32>
    %8 = vector.extract_strided_slice %7 {offsets = [0, 0], sizes = [8, 16], strides = [1, 1]} : vector<8x32xf32> to vector<8x16xf32>
    %9 = vector.extract_strided_slice %7 {offsets = [0, 16], sizes = [8, 16], strides = [1, 1]} : vector<8x32xf32> to vector<8x16xf32>
    %c135 = arith.constant 135 : index
    %c0_4 = arith.constant 0 : index
    %10 = vector.load %arg2[%c135, %c0_4] : memref<136x128xf32, #tpu.memory_space<vmem>>, vector<1x16xf32>
    %cst_5 = arith.constant 5.000000e-01 : f32
    %11 = vector.broadcast %cst_5 : f32 to vector<1x16xf32>
    %12 = arith.cmpf ogt, %10, %11 : vector<1x16xf32>
    %13 = math.sqrt %8 : vector<8x16xf32>
    %14 = vector.shape_cast %12 : vector<1x16xi1> to vector<1x16xi1>
    %15 = vector.broadcast %14 : vector<1x16xi1> to vector<8x16xi1>
    %16 = arith.select %15, %9, %13 : vector<8x16xi1>, vector<8x16xf32>
    %17 = arith.mulf %16, %16 : vector<8x16xf32>
    %18 = tpu.concatenate %16, %17 in 1 : vector<8x16xf32>, vector<8x16xf32> -> vector<8x32xf32>
    %cst_6 = arith.constant dense<0.000000e+00> : vector<32xf32>
    %19 = vector.multi_reduction <add>, %18, %cst_6 [0] : vector<8x32xf32> to vector<32xf32>
    %20 = vector.shape_cast %19 : vector<32xf32> to vector<1x32xf32>
    %c0_7 = arith.constant 0 : index
    %c0_8 = arith.constant 0 : index
    %21 = vector.load %arg3[%c0_7, %c0_8] : memref<8x128xf32, #tpu.memory_space<vmem>>, vector<1x32xf32>
    %22 = arith.addf %21, %20 : vector<1x32xf32>
    %c0_9 = arith.constant 0 : index
    %c0_10 = arith.constant 0 : index
    %23 = vector.load %arg3[%c0_9, %c0_10] : memref<8x128xf32, #tpu.memory_space<vmem>>, vector<1x32xf32>
    tpu.vector_store %arg3[%c0_9, %c0_10], %22 {strides = array<i32>} : memref<8x128xf32, #tpu.memory_space<vmem>>, vector<1x32xf32>,
    return
  }
  func.func @transform_0(%arg0: i32) -> (i32, i32) {
    %c0_i32 = arith.constant 0 : i32
    %c0_i32_0 = arith.constant 0 : i32
    return %arg0, %c0_i32 : i32, i32
  }
  func.func @transform_1(%arg0: i32) -> (i32, i32) {
    %c0_i32 = arith.constant 0 : i32
    %c0_i32_0 = arith.constant 0 : i32
    %c0_i32_1 = arith.constant 0 : i32
    return %c0_i32, %c0_i32_0 : i32, i32
  }
  func.func @transform_2(%arg0: i32) -> (i32, i32) {
    %c0_i32 = arith.constant 0 : i32
    %c0_i32_0 = arith.constant 0 : i32
    %c0_i32_1 = arith.constant 0 : i32
    return %c0_i32, %c0_i32_0 : i32, i32
  }
}

module attributes {stable_mosaic.version = 11 : i64} {
  func.func @_mini2d_kernel(%arg0: i32, %arg1: memref<8x64xf32, #tpu.memory_space<vmem>>, %arg2: memref<8x1024xf32, #tpu.memory_space<vmem>>, %arg3: memref<136x128xf32, #tpu.memory_space<vmem>>, %arg4: memref<80x1024xf32, #tpu.memory_space<vmem>>, %arg5: memref<8x128xf32, #tpu.memory_space<vmem>>, %arg6: memref<8x64xf32, #tpu.memory_space<vmem>>, %arg7: memref<8x1024xf32, #tpu.memory_space<vmem>>) attributes {dimension_semantics = [#tpu.dimension_semantics<parallel>], iteration_bounds = array<i64: 4>, scalar_prefetch = 0 : i64, scratch_operands = 0 : i64, tpu.core_type = #tpu.core_type<tc>, window_params = [{transform_indices = @transform_0, window_bounds = array<i64: 8, 64>}, {transform_indices = @transform_1, window_bounds = array<i64: 8, 1024>}, {pipeline_mode = #tpu.pipeline_mode<synchronous>, transform_indices = @transform_2, window_bounds = array<i64: 136, 128>}, {pipeline_mode = #tpu.pipeline_mode<synchronous>, transform_indices = @transform_3, window_bounds = array<i64: 80, 1024>}, {pipeline_mode = #tpu.pipeline_mode<synchronous>, transform_indices = @transform_4, window_bounds = array<i64: 8, 128>}, {transform_indices = @transform_5, window_bounds = array<i64: 8, 64>}, {transform_indices = @transform_6, window_bounds = array<i64: 8, 1024>}]} {
    %c0 = arith.constant 0 : index
    %c0_0 = arith.constant 0 : index
    %0 = vector.load %arg1[%c0, %c0_0] : memref<8x64xf32, #tpu.memory_space<vmem>>, vector<8x64xf32>
    %c0_1 = arith.constant 0 : index
    %c0_2 = arith.constant 0 : index
    %1 = vector.load %arg2[%c0_1, %c0_2] : memref<8x1024xf32, #tpu.memory_space<vmem>>, vector<8x1024xf32>
    %c0_3 = arith.constant 0 : index
    %c0_4 = arith.constant 0 : index
    %2 = vector.load %arg3[%c0_3, %c0_4] : memref<136x128xf32, #tpu.memory_space<vmem>>, vector<32x128xf32>
    %c32 = arith.constant 32 : index
    %c0_5 = arith.constant 0 : index
    %3 = vector.load %arg3[%c32, %c0_5] : memref<136x128xf32, #tpu.memory_space<vmem>>, vector<64x64xf32>
    %c96 = arith.constant 96 : index
    %c0_6 = arith.constant 0 : index
    %4 = vector.load %arg3[%c96, %c0_6] : memref<136x128xf32, #tpu.memory_space<vmem>>, vector<16x16xf32>
    %c112 = arith.constant 112 : index
    %c0_7 = arith.constant 0 : index
    %5 = vector.load %arg3[%c112, %c0_7] : memref<136x128xf32, #tpu.memory_space<vmem>>, vector<16x16xf32>
    %c128 = arith.constant 128 : index
    %c0_8 = arith.constant 0 : index
    %6 = vector.load %arg3[%c128, %c0_8] : memref<136x128xf32, #tpu.memory_space<vmem>>, vector<1x16xf32>
    %c129 = arith.constant 129 : index
    %c0_9 = arith.constant 0 : index
    %7 = vector.load %arg3[%c129, %c0_9] : memref<136x128xf32, #tpu.memory_space<vmem>>, vector<1x16xf32>
    %c130 = arith.constant 130 : index
    %c0_10 = arith.constant 0 : index
    %8 = vector.load %arg3[%c130, %c0_10] : memref<136x128xf32, #tpu.memory_space<vmem>>, vector<4x4xf32>
    %c134 = arith.constant 134 : index
    %c0_11 = arith.constant 0 : index
    %9 = vector.load %arg3[%c134, %c0_11] : memref<136x128xf32, #tpu.memory_space<vmem>>, vector<1x4xf32>
    %c0_12 = arith.constant 0 : index
    %c0_13 = arith.constant 0 : index
    %10 = vector.load %arg5[%c0_12, %c0_13] : memref<8x128xf32, #tpu.memory_space<vmem>>, vector<1x16xf32>
    %c1 = arith.constant 1 : index
    %c0_14 = arith.constant 0 : index
    %11 = vector.load %arg5[%c1, %c0_14] : memref<8x128xf32, #tpu.memory_space<vmem>>, vector<1x16xf32>
    %c0_15 = arith.constant 0 : index
    %c0_16 = arith.constant 0 : index
    %12 = vector.load %arg4[%c0_15, %c0_16] : memref<80x1024xf32, #tpu.memory_space<vmem>>, vector<64x1024xf32>
    %c71 = arith.constant 71 : index
    %c0_17 = arith.constant 0 : index
    %13 = vector.load %arg4[%c71, %c0_17] : memref<80x1024xf32, #tpu.memory_space<vmem>>, vector<1x1024xf32>
    %c72 = arith.constant 72 : index
    %c0_18 = arith.constant 0 : index
    %14 = vector.load %arg4[%c72, %c0_18] : memref<80x1024xf32, #tpu.memory_space<vmem>>, vector<1x1024xf32>
    %c73 = arith.constant 73 : index
    %c0_19 = arith.constant 0 : index
    %15 = vector.load %arg4[%c73, %c0_19] : memref<80x1024xf32, #tpu.memory_space<vmem>>, vector<1x1024xf32>
    %c74 = arith.constant 74 : index
    %c0_20 = arith.constant 0 : index
    %16 = vector.load %arg4[%c74, %c0_20] : memref<80x1024xf32, #tpu.memory_space<vmem>>, vector<1x1024xf32>
    %17 = arith.mulf %0, %0 : vector<8x64xf32>
    %18 = tpu.concatenate %17, %0 in 1 : vector<8x64xf32>, vector<8x64xf32> -> vector<8x128xf32>
    %c0_21 = arith.constant 0 : index
    %c0_22 = arith.constant 0 : index
    %19 = vector.load %arg3[%c0_21, %c0_22] : memref<136x128xf32, #tpu.memory_space<vmem>>, vector<32x128xf32>
    %cst = arith.constant dense<0.000000e+00> : vector<8x32xf32>
    %20 = tpu.matmul %18, %19, %cst {dimension_numbers = #tpu.dot_dimension_numbers<[1], [1], [0], [0], [0, 0, 1, 0], [], []>} : vector<8x128xf32>, vector<32x128xf32>, vector<8x32xf32> -> vector<8x32xf32>
    %21 = vector.extract_strided_slice %20 {offsets = [0, 0], sizes = [8, 16], strides = [1, 1]} : vector<8x32xf32> to vector<8x16xf32>
    %22 = vector.extract_strided_slice %20 {offsets = [0, 16], sizes = [8, 16], strides = [1, 1]} : vector<8x32xf32> to vector<8x16xf32>
    %c135 = arith.constant 135 : index
    %c0_23 = arith.constant 0 : index
    %23 = vector.load %arg3[%c135, %c0_23] : memref<136x128xf32, #tpu.memory_space<vmem>>, vector<1x16xf32>
    %cst_24 = arith.constant 5.000000e-01 : f32
    %24 = vector.broadcast %cst_24 : f32 to vector<1x16xf32>
    %25 = arith.cmpf ogt, %23, %24 : vector<1x16xf32>
    %26 = math.sqrt %21 : vector<8x16xf32>
    %27 = vector.shape_cast %25 : vector<1x16xi1> to vector<1x16xi1>
    %28 = vector.broadcast %27 : vector<1x16xi1> to vector<8x16xi1>
    %29 = arith.select %28, %22, %26 : vector<8x16xi1>, vector<8x16xf32>
    %30 = vector.broadcast %10 : vector<1x16xf32> to vector<8x16xf32>
    %31 = arith.mulf %29, %30 : vector<8x16xf32>
    %32 = vector.broadcast %11 : vector<1x16xf32> to vector<8x16xf32>
    %33 = arith.addf %31, %32 : vector<8x16xf32>
    %34 = math.absf %29 : vector<8x16xf32>
    %cst_25 = arith.constant 0.00999999977 : f32
    %35 = vector.broadcast %cst_25 : f32 to vector<8x16xf32>
    %36 = arith.addf %34, %35 : vector<8x16xf32>
    %37 = tpu.reciprocal %36 {approx = true} : vector<8x16xf32> -> vector<8x16xf32>
    %cst_26 = arith.constant dense<0.000000e+00> : vector<8x16xf32>
    %38 = tpu.matmul %33, %4, %cst_26 {dimension_numbers = #tpu.dot_dimension_numbers<[1], [0], [0], [1], [0, 0, 1, 1], [], []>} : vector<8x16xf32>, vector<16x16xf32>, vector<8x16xf32> -> vector<8x16xf32>
    %39 = vector.broadcast %6 : vector<1x16xf32> to vector<8x16xf32>
    %40 = arith.addf %38, %39 : vector<8x16xf32>
    %41 = arith.negf %40 : vector<8x16xf32>
    %42 = math.exp %41 : vector<8x16xf32>
    %cst_27 = arith.constant 1.000000e+00 : f32
    %43 = vector.broadcast %cst_27 : f32 to vector<8x16xf32>
    %44 = arith.addf %43, %42 : vector<8x16xf32>
    %45 = arith.divf %43, %44 : vector<8x16xf32>
    %46 = arith.mulf %40, %45 : vector<8x16xf32>
    %cst_28 = arith.constant dense<0.000000e+00> : vector<8x16xf32>
    %47 = tpu.matmul %46, %5, %cst_28 {dimension_numbers = #tpu.dot_dimension_numbers<[1], [0], [0], [1], [0, 0, 1, 1], [], []>} : vector<8x16xf32>, vector<16x16xf32>, vector<8x16xf32> -> vector<8x16xf32>
    %48 = vector.broadcast %7 : vector<1x16xf32> to vector<8x16xf32>
    %49 = arith.addf %47, %48 : vector<8x16xf32>
    %50 = tpu.concatenate %37, %49 in 1 : vector<8x16xf32>, vector<8x16xf32> -> vector<8x32xf32>
    %cst_29 = arith.constant dense<0.000000e+00> : vector<8x128xf32>
    %51 = tpu.matmul %50, %2, %cst_29 {dimension_numbers = #tpu.dot_dimension_numbers<[1], [0], [0], [1], [0, 0, 1, 1], [], []>} : vector<8x32xf32>, vector<32x128xf32>, vector<8x128xf32> -> vector<8x128xf32>
    %52 = vector.extract_strided_slice %51 {offsets = [0, 0], sizes = [8, 64], strides = [1, 1]} : vector<8x128xf32> to vector<8x64xf32>
    %53 = vector.extract_strided_slice %51 {offsets = [0, 64], sizes = [8, 64], strides = [1, 1]} : vector<8x128xf32> to vector<8x64xf32>
    %54 = arith.mulf %0, %52 : vector<8x64xf32>
    %cst_30 = arith.constant dense<0.000000e+00> : vector<8x64xf32>
    %55 = tpu.matmul %54, %3, %cst_30 {dimension_numbers = #tpu.dot_dimension_numbers<[1], [0], [0], [1], [0, 0, 1, 1], [], []>} : vector<8x64xf32>, vector<64x64xf32>, vector<8x64xf32> -> vector<8x64xf32>
    %56 = arith.mulf %55, %53 : vector<8x64xf32>
    %c0_31 = arith.constant 0 : index
    %c0_32 = arith.constant 0 : index
    %57 = vector.load %arg6[%c0_31, %c0_32] : memref<8x64xf32, #tpu.memory_space<vmem>>, vector<8x64xf32>
    tpu.vector_store %arg6[%c0_31, %c0_32], %56 {strides = array<i32>} : memref<8x64xf32, #tpu.memory_space<vmem>>, vector<8x64xf32>,
    %cst_33 = arith.constant dense<0.000000e+00> : vector<8x1024xf32>
    %58 = tpu.matmul %56, %12, %cst_33 {dimension_numbers = #tpu.dot_dimension_numbers<[1], [0], [0], [1], [0, 0, 1, 1], [], []>} : vector<8x64xf32>, vector<64x1024xf32>, vector<8x1024xf32> -> vector<8x1024xf32>
    %59 = tpu.concatenate %56, %56 in 1 : vector<8x64xf32>, vector<8x64xf32> -> vector<8x128xf32>
    %60 = tpu.concatenate %59, %59, %59, %59, %59, %59, %59, %59 in 1 : vector<8x128xf32>, vector<8x128xf32>, vector<8x128xf32>, vector<8x128xf32>, vector<8x128xf32>, vector<8x128xf32>, vector<8x128xf32>, vector<8x128xf32> -> vector<8x1024xf32>
    %61 = arith.mulf %1, %58 : vector<8x1024xf32>
    %62 = arith.mulf %61, %60 : vector<8x1024xf32>
    %63 = vector.broadcast %13 : vector<1x1024xf32> to vector<8x1024xf32>
    %64 = arith.mulf %62, %63 : vector<8x1024xf32>
    %cst_34 = arith.constant dense<0.000000e+00> : vector<8xf32>
    %65 = vector.multi_reduction <add>, %64, %cst_34 [1] : vector<8x1024xf32> to vector<8xf32>
    %66 = vector.shape_cast %65 : vector<8xf32> to vector<8x1xf32>
    %67 = vector.broadcast %14 : vector<1x1024xf32> to vector<8x1024xf32>
    %68 = arith.mulf %62, %67 : vector<8x1024xf32>
    %cst_35 = arith.constant dense<0.000000e+00> : vector<8xf32>
    %69 = vector.multi_reduction <add>, %68, %cst_35 [1] : vector<8x1024xf32> to vector<8xf32>
    %70 = vector.shape_cast %69 : vector<8xf32> to vector<8x1xf32>
    %71 = vector.broadcast %15 : vector<1x1024xf32> to vector<8x1024xf32>
    %72 = arith.mulf %62, %71 : vector<8x1024xf32>
    %cst_36 = arith.constant dense<0.000000e+00> : vector<8xf32>
    %73 = vector.multi_reduction <add>, %72, %cst_36 [1] : vector<8x1024xf32> to vector<8xf32>
    %74 = vector.shape_cast %73 : vector<8xf32> to vector<8x1xf32>
    %75 = vector.broadcast %16 : vector<1x1024xf32> to vector<8x1024xf32>
    %76 = arith.mulf %62, %75 : vector<8x1024xf32>
    %cst_37 = arith.constant dense<0.000000e+00> : vector<8xf32>
    %77 = vector.multi_reduction <add>, %76, %cst_37 [1] : vector<8x1024xf32> to vector<8xf32>
    %78 = vector.shape_cast %77 : vector<8xf32> to vector<8x1xf32>
    %79 = tpu.concatenate %66, %70, %74, %78 in 1 : vector<8x1xf32>, vector<8x1xf32>, vector<8x1xf32>, vector<8x1xf32> -> vector<8x4xf32>
    %80 = vector.extract_strided_slice %79 {offsets = [0, 0], sizes = [8, 1], strides = [1, 1]} : vector<8x4xf32> to vector<8x1xf32>
    %81 = vector.extract_strided_slice %8 {offsets = [0, 0], sizes = [1, 4], strides = [1, 1]} : vector<4x4xf32> to vector<1x4xf32>
    %82 = vector.broadcast %80 : vector<8x1xf32> to vector<8x4xf32>
    %83 = vector.broadcast %81 : vector<1x4xf32> to vector<8x4xf32>
    %84 = arith.mulf %82, %83 : vector<8x4xf32>
    %85 = vector.broadcast %9 : vector<1x4xf32> to vector<8x4xf32>
    %86 = arith.addf %85, %84 : vector<8x4xf32>
    %87 = vector.extract_strided_slice %79 {offsets = [0, 1], sizes = [8, 1], strides = [1, 1]} : vector<8x4xf32> to vector<8x1xf32>
    %88 = vector.extract_strided_slice %8 {offsets = [1, 0], sizes = [1, 4], strides = [1, 1]} : vector<4x4xf32> to vector<1x4xf32>
    %89 = vector.broadcast %87 : vector<8x1xf32> to vector<8x4xf32>
    %90 = vector.broadcast %88 : vector<1x4xf32> to vector<8x4xf32>
    %91 = arith.mulf %89, %90 : vector<8x4xf32>
    %92 = arith.addf %86, %91 : vector<8x4xf32>
    %93 = vector.extract_strided_slice %79 {offsets = [0, 2], sizes = [8, 1], strides = [1, 1]} : vector<8x4xf32> to vector<8x1xf32>
    %94 = vector.extract_strided_slice %8 {offsets = [2, 0], sizes = [1, 4], strides = [1, 1]} : vector<4x4xf32> to vector<1x4xf32>
    %95 = vector.broadcast %93 : vector<8x1xf32> to vector<8x4xf32>
    %96 = vector.broadcast %94 : vector<1x4xf32> to vector<8x4xf32>
    %97 = arith.mulf %95, %96 : vector<8x4xf32>
    %98 = arith.addf %92, %97 : vector<8x4xf32>
    %99 = vector.extract_strided_slice %79 {offsets = [0, 3], sizes = [8, 1], strides = [1, 1]} : vector<8x4xf32> to vector<8x1xf32>
    %100 = vector.extract_strided_slice %8 {offsets = [3, 0], sizes = [1, 4], strides = [1, 1]} : vector<4x4xf32> to vector<1x4xf32>
    %101 = vector.broadcast %99 : vector<8x1xf32> to vector<8x4xf32>
    %102 = vector.broadcast %100 : vector<1x4xf32> to vector<8x4xf32>
    %103 = arith.mulf %101, %102 : vector<8x4xf32>
    %104 = arith.addf %98, %103 : vector<8x4xf32>
    %105 = arith.negf %104 : vector<8x4xf32>
    %106 = math.exp %105 : vector<8x4xf32>
    %cst_38 = arith.constant 1.000000e+00 : f32
    %107 = vector.broadcast %cst_38 : f32 to vector<8x4xf32>
    %108 = arith.addf %107, %106 : vector<8x4xf32>
    %109 = arith.divf %107, %108 : vector<8x4xf32>
    %110 = arith.mulf %104, %109 : vector<8x4xf32>
    %111 = vector.extract_strided_slice %110 {offsets = [0, 0], sizes = [8, 1], strides = [1, 1]} : vector<8x4xf32> to vector<8x1xf32>
    %112 = vector.broadcast %111 : vector<8x1xf32> to vector<8x1024xf32>
    %113 = vector.broadcast %13 : vector<1x1024xf32> to vector<8x1024xf32>
    %114 = arith.mulf %112, %113 : vector<8x1024xf32>
    %115 = vector.extract_strided_slice %110 {offsets = [0, 1], sizes = [8, 1], strides = [1, 1]} : vector<8x4xf32> to vector<8x1xf32>
    %116 = vector.broadcast %115 : vector<8x1xf32> to vector<8x1024xf32>
    %117 = vector.broadcast %14 : vector<1x1024xf32> to vector<8x1024xf32>
    %118 = arith.mulf %116, %117 : vector<8x1024xf32>
    %119 = arith.addf %114, %118 : vector<8x1024xf32>
    %120 = vector.extract_strided_slice %110 {offsets = [0, 2], sizes = [8, 1], strides = [1, 1]} : vector<8x4xf32> to vector<8x1xf32>
    %121 = vector.broadcast %120 : vector<8x1xf32> to vector<8x1024xf32>
    %122 = vector.broadcast %15 : vector<1x1024xf32> to vector<8x1024xf32>
    %123 = arith.mulf %121, %122 : vector<8x1024xf32>
    %124 = arith.addf %119, %123 : vector<8x1024xf32>
    %125 = vector.extract_strided_slice %110 {offsets = [0, 3], sizes = [8, 1], strides = [1, 1]} : vector<8x4xf32> to vector<8x1xf32>
    %126 = vector.broadcast %125 : vector<8x1xf32> to vector<8x1024xf32>
    %127 = vector.broadcast %16 : vector<1x1024xf32> to vector<8x1024xf32>
    %128 = arith.mulf %126, %127 : vector<8x1024xf32>
    %129 = arith.addf %124, %128 : vector<8x1024xf32>
    %c67 = arith.constant 67 : index
    %c0_39 = arith.constant 0 : index
    %130 = vector.load %arg4[%c67, %c0_39] : memref<80x1024xf32, #tpu.memory_space<vmem>>, vector<1x1024xf32>
    %131 = vector.broadcast %130 : vector<1x1024xf32> to vector<8x1024xf32>
    %132 = arith.mulf %1, %131 : vector<8x1024xf32>
    %c1021_i32 = arith.constant 1021 : i32
    %133 = tpu.dynamic_rotate %1 by %c1021_i32 dim 1 : vector<8x1024xf32>, i32 -> vector<8x1024xf32>
    %c64 = arith.constant 64 : index
    %c0_40 = arith.constant 0 : index
    %134 = vector.load %arg4[%c64, %c0_40] : memref<80x1024xf32, #tpu.memory_space<vmem>>, vector<1x1024xf32>
    %135 = vector.broadcast %134 : vector<1x1024xf32> to vector<8x1024xf32>
    %136 = arith.mulf %133, %135 : vector<8x1024xf32>
    %137 = arith.addf %132, %136 : vector<8x1024xf32>
    %c1022_i32 = arith.constant 1022 : i32
    %138 = tpu.dynamic_rotate %1 by %c1022_i32 dim 1 : vector<8x1024xf32>, i32 -> vector<8x1024xf32>
    %c65 = arith.constant 65 : index
    %c0_41 = arith.constant 0 : index
    %139 = vector.load %arg4[%c65, %c0_41] : memref<80x1024xf32, #tpu.memory_space<vmem>>, vector<1x1024xf32>
    %140 = vector.broadcast %139 : vector<1x1024xf32> to vector<8x1024xf32>
    %141 = arith.mulf %138, %140 : vector<8x1024xf32>
    %142 = arith.addf %137, %141 : vector<8x1024xf32>
    %c1023_i32 = arith.constant 1023 : i32
    %143 = tpu.dynamic_rotate %1 by %c1023_i32 dim 1 : vector<8x1024xf32>, i32 -> vector<8x1024xf32>
    %c66 = arith.constant 66 : index
    %c0_42 = arith.constant 0 : index
    %144 = vector.load %arg4[%c66, %c0_42] : memref<80x1024xf32, #tpu.memory_space<vmem>>, vector<1x1024xf32>
    %145 = vector.broadcast %144 : vector<1x1024xf32> to vector<8x1024xf32>
    %146 = arith.mulf %143, %145 : vector<8x1024xf32>
    %147 = arith.addf %142, %146 : vector<8x1024xf32>
    %c1_i32 = arith.constant 1 : i32
    %148 = tpu.dynamic_rotate %1 by %c1_i32 dim 1 : vector<8x1024xf32>, i32 -> vector<8x1024xf32>
    %c68 = arith.constant 68 : index
    %c0_43 = arith.constant 0 : index
    %149 = vector.load %arg4[%c68, %c0_43] : memref<80x1024xf32, #tpu.memory_space<vmem>>, vector<1x1024xf32>
    %150 = vector.broadcast %149 : vector<1x1024xf32> to vector<8x1024xf32>
    %151 = arith.mulf %148, %150 : vector<8x1024xf32>
    %152 = arith.addf %147, %151 : vector<8x1024xf32>
    %c2_i32 = arith.constant 2 : i32
    %153 = tpu.dynamic_rotate %1 by %c2_i32 dim 1 : vector<8x1024xf32>, i32 -> vector<8x1024xf32>
    %c69 = arith.constant 69 : index
    %c0_44 = arith.constant 0 : index
    %154 = vector.load %arg4[%c69, %c0_44] : memref<80x1024xf32, #tpu.memory_space<vmem>>, vector<1x1024xf32>
    %155 = vector.broadcast %154 : vector<1x1024xf32> to vector<8x1024xf32>
    %156 = arith.mulf %153, %155 : vector<8x1024xf32>
    %157 = arith.addf %152, %156 : vector<8x1024xf32>
    %c3_i32 = arith.constant 3 : i32
    %158 = tpu.dynamic_rotate %1 by %c3_i32 dim 1 : vector<8x1024xf32>, i32 -> vector<8x1024xf32>
    %c70 = arith.constant 70 : index
    %c0_45 = arith.constant 0 : index
    %159 = vector.load %arg4[%c70, %c0_45] : memref<80x1024xf32, #tpu.memory_space<vmem>>, vector<1x1024xf32>
    %160 = vector.broadcast %159 : vector<1x1024xf32> to vector<8x1024xf32>
    %161 = arith.mulf %158, %160 : vector<8x1024xf32>
    %162 = arith.addf %157, %161 : vector<8x1024xf32>
    %163 = arith.mulf %162, %129 : vector<8x1024xf32>
    %c0_46 = arith.constant 0 : index
    %c0_47 = arith.constant 0 : index
    %164 = vector.load %arg7[%c0_46, %c0_47] : memref<8x1024xf32, #tpu.memory_space<vmem>>, vector<8x1024xf32>
    tpu.vector_store %arg7[%c0_46, %c0_47], %163 {strides = array<i32>} : memref<8x1024xf32, #tpu.memory_space<vmem>>, vector<8x1024xf32>,
    return
  }
  func.func @transform_0(%arg0: i32) -> (i32, i32) {
    %c0_i32 = arith.constant 0 : i32
    %c0_i32_0 = arith.constant 0 : i32
    return %arg0, %c0_i32 : i32, i32
  }
  func.func @transform_1(%arg0: i32) -> (i32, i32) {
    %c0_i32 = arith.constant 0 : i32
    %c0_i32_0 = arith.constant 0 : i32
    return %arg0, %c0_i32 : i32, i32
  }
  func.func @transform_2(%arg0: i32) -> (i32, i32) {
    %c0_i32 = arith.constant 0 : i32
    %c0_i32_0 = arith.constant 0 : i32
    %c0_i32_1 = arith.constant 0 : i32
    return %c0_i32, %c0_i32_0 : i32, i32
  }
  func.func @transform_3(%arg0: i32) -> (i32, i32) {
    %c0_i32 = arith.constant 0 : i32
    %c0_i32_0 = arith.constant 0 : i32
    %c0_i32_1 = arith.constant 0 : i32
    return %c0_i32, %c0_i32_0 : i32, i32
  }
  func.func @transform_4(%arg0: i32) -> (i32, i32) {
    %c0_i32 = arith.constant 0 : i32
    %c0_i32_0 = arith.constant 0 : i32
    %c0_i32_1 = arith.constant 0 : i32
    return %c0_i32, %c0_i32_0 : i32, i32
  }
  func.func @transform_5(%arg0: i32) -> (i32, i32) {
    %c0_i32 = arith.constant 0 : i32
    %c0_i32_0 = arith.constant 0 : i32
    return %arg0, %c0_i32 : i32, i32
  }
  func.func @transform_6(%arg0: i32) -> (i32, i32) {
    %c0_i32 = arith.constant 0 : i32
    %c0_i32_0 = arith.constant 0 : i32
    return %arg0, %c0_i32 : i32, i32
  }
}

</mosaic_0001>

<bundles_post_ra>
// kernel: mini2d_so3_forward.2
= control target key start
LH: loop header
LB: loop body
LE: loop exit
PB: predicated region body
PF: predicated region fallthrough
CT: control target
= control target key end

     0   :  { %7 = vsyncpa [#allocation3], 0  ;;  %s707_s0 = inlined_call_operand.hbm [shape: f32[32,64], index: 0, kind: input, shape index: {}]   ;;  %s708_s1 = inlined_call_operand.hbm [shape: f32[136,128], index: 1, kind: input, shape index: {}]   ;;  %s709_s2 = inlined_call_operand.vmem [shape: f32[8,128], index: 2, kind: output, shape index: {}]  }
   0x1   :  { %9 = vsyncpa [#allocation3 + $0x1], 0 }
   0x2   :  { %10 = vsyncpa [#allocation5], 0  ;;  %s557_s9 = smov 0   ;;  %s559_s10 = smov 0  }
   0x3   :  { %s561_s11 = smov 0   ;;  %s563_s12 = smov 0  }
   0x4 LB: > { %s336_s13 = sadd.s32 4294967295, %s528_s12   ;;  %p36_p0 = scmp.ne.s32.totalorder %s520_s10, %s516_s9  ;;  %s528_s12 = sphi %s563_s12, %s727_s12   ;;  %s524_s11 = sphi %s561_s11, %s726_s11   ;;  %s520_s10 = sphi %s559_s10, %s725_s10   ;;  %s516_s9 = sphi %s557_s9, %s724_s9  }
   0x5   : > { %p577_p1 = scmp.eq.s32.totalorder %s336_s13, 0  ;;  %p337_p2 = scmp.ge.s32.totalorder %s528_s12, 1 }
   0x6   : > { %p89_p3 = scmp.lt.s32.totalorder %s528_s12, 5  ;;  %p583_p4 = scmp.ne.s32.totalorder %s336_s13, 0 }
   0x7   : > { %s714_s14 = scalar_select %p577_p1, 1, 0 }
   0x8   : > { %s715_s15 = scalar_select %p583_p4, 1, 0 }
   0x9   : > { %p589_p5 = por %p577_p1, %p36_p0  ;;  %p593_p6 = pnand %p337_p2, %p89_p3 }
   0xa   : > { %s530_s18 = smov [#allocation4]   ;;  %s606_s21 = sadd.s32 1, %s528_s12  }
   0xb   : > { %s716_s16 = scalar_select %p589_p5, 1, 0 }
   0xc   : > { %s717_s17 = scalar_select %p593_p6, 1, 0 }
   0xd   : > { %s101_s19 = sshll.u32 %s530_s18, 4  ;;  %p376_p7 = pneg %p593_p6  ;;  %s102_s19 = int_to_ptr.vmem [resolvable:$true] %s101_s19 }
   0xe   : > { %s23_s22 = sadd.s32 1, %s524_s11  ;;  %s20_s23 = ssub.s32 %s528_s12, %s606_s21 }
   0xf   : > { %p601_p8 = pnand %p376_p7, %p577_p1  ;;  %s432_s26 = scalar_lea.hbm %s708_s1, 2176 }
  0x10   : > { %p433_p9 = scmp.ne.s32.totalorder %s708_s1, %s432_s26  ;;  %p439_p13 = scmp.lt.u32.totalorder %s432_s26, %s708_s1 }
  0x11   : > { %p434_p10 = pneg %p601_p8 }
  0x13   : > { %p435_p11 = pnand %p434_p10, %p433_p9 }
  0x15   : > { %p436_p12 = pneg %p435_p11 }
  0x17   : > { %p441_p0 = pnand %p439_p13, %p436_p12 }
  0x19   : > { %444 = shalt.err (!%p441_p0)
}
  0x1a   : > { %s445_s3 = scalar_lea.vmem %s102_s19, 2176  ;;  %p453_p4 = scmp.lt.s32.totalorder %s102_s19, %s102_s19 }
  0x1b   : > { %p446_p2 = scmp.ne.s32.totalorder %s102_s19, %s445_s3  ;;  %p454_p1 = scmp.lt.s32.totalorder %s445_s3, %s445_s3 }
  0x1d   : > { %p448_p3 = pnand %p446_p2, %p434_p10  ;;  %p455_p5 = por %p454_p1, %p453_p4 }
  0x1f   : > { %p449_p7 = pneg %p448_p3 }
  0x21   : > { %p456_p6 = pnand %p455_p5, %p449_p7 }
  0x23   : > { %459 = shalt.err (!%p456_p6)
}
  0x24   : > { %s531_s4 = smov 128   ;;  %s532_s5 = smov 8  }
  0x25   : > { %379 = dma.hbm_to_vmem [thread:$0]  (!%p601_p8), %s708_s1, 2176, %s102_s19, [#allocation5], %s531_s4, %s531_s4, %s532_s5  }
  0x26   : > { %p21_p9 = scmp.eq.s32.totalorder %s20_s23, 0  ;;  %p30_p10 = scmp.ne.s32.totalorder %s524_s11, %s520_s10 }
  0x27   : > { %p31_p1 = scmp.eq.s32.totalorder %s528_s12, 0  ;;  %p385_p4 = scmp.lt.s32.totalorder %s528_s12, 4 }
  0x28   : > { %s632_s8 = scalar_select %p21_p9, %s524_s11, %s23_s22  }
  0x29   : > { %p32_p5 = por %p31_p1, %p30_p10  ;;  %s115_s9 = sand.u32 1, %s524_s11  }
  0x2a   : > { %s340_s13 = sshll.u32 %s115_s9, 3  ;;  %s341_s18 = sshll.u32 %s528_s12, 7 }
  0x2b   : > { %s639_s26 = scalar_lea.hbm %s707_s0, %s341_s18  ;;  %s119_s19 = scalar_lea.vmem [#allocation2], %s340_s13 }
  0x2c   : > { %s126_s20 = sshll.u32 %s119_s19, 4  ;;  %p643_p6 = pnand %p385_p4, %p32_p5  ;;  %s641_s20 = int_to_ptr.vmem [resolvable:$true] %s126_s20 }
  0x2d   : > { %s116_s12 = scalar_lea.sflag [#allocation3], %s115_s9  ;;  %s460_s23 = scalar_lea.hbm %s639_s26, 128 }
  0x2e   : > { %p461_p8 = scmp.ne.s32.totalorder %s639_s26, %s460_s23  ;;  %p462_p11 = pneg %p643_p6 }
  0x2f   : > { %s465_s29 = scalar_lea.hbm %s707_s0, 512  ;;  %p466_p0 = scmp.lt.u32.totalorder %s639_s26, %s707_s0 }
  0x30   : > { %p463_p12 = pnand %p462_p11, %p461_p8  ;;  %p467_p2 = scmp.lt.u32.totalorder %s465_s29, %s460_s23 }
  0x31   : > { %p469_p7 = scmp.lt.u32.totalorder %s460_s23, %s639_s26 }
  0x32   : > { %p464_p13 = pneg %p463_p12  ;;  %p468_p3 = por %p467_p2, %p466_p0 }
  0x34   : > { %p470_p9 = por %p469_p7, %p468_p3 }
  0x36   : > { %p471_p10 = pnand %p470_p9, %p464_p13 }
  0x38   : > { %474 = shalt.err (!%p471_p10)
}
  0x39   : > { %s475_s4 = scalar_lea.vmem %s641_s20, 128  ;;  %s533_s5 = smov [#allocation2]  }
  0x3a   : > { %p476_p1 = scmp.ne.s32.totalorder %s641_s20, %s475_s4  ;;  %s480_s6 = sshll.u32 %s533_s5, 4  ;;  %s481_s6 = int_to_ptr.vmem [resolvable:$false] %s480_s6 }
  0x3b   : > { %s482_s7 = scalar_lea.vmem %s481_s6, 256  ;;  %p483_p8 = scmp.lt.s32.totalorder %s641_s20, %s481_s6 }
  0x3c   : > { %p478_p4 = pnand %p476_p1, %p462_p11  ;;  %p484_p12 = scmp.lt.s32.totalorder %s482_s7, %s475_s4 }
  0x3e   : > { %p479_p5 = pneg %p478_p4  ;;  %p485_p0 = por %p484_p12, %p483_p8 }
  0x40   : > { %p486_p2 = pnand %p485_p0, %p479_p5 }
  0x42   : > { %489 = shalt.err (!%p486_p2)
}
  0x43   : > { %383 = dma.hbm_to_vmem [thread:$0]  (!%p643_p6), %s639_s26, 128, %s641_s20, %s116_s12  }
  0x44   : > { %p720_p13 = scmp.ne.s32.totalorder %s717_s17, 0 }
  0x45   : > { %s137_s9 = sand.u32 (!%p720_p13), 1, %s520_s10   ;;  %p721_p11 = scmp.ne.s32.totalorder (!%p720_p13), %s716_s16, 0 }
  0x46   : > { %135 = sbr.rel (%p720_p13) target bundleno = 669 (0x29d), region = 28  ;;  %s343_s13 = sshll.u32 (!%p720_p13), %s137_s9, 3 }
  0x47   : > { %s138_s18 = scalar_lea.sflag (!%p720_p13), [#allocation3], %s137_s9  ;;  %s141_s24 = scalar_lea.vmem (!%p720_p13), [#allocation2], %s343_s13 }
  0x4d   : > { %507 = dma.done.wait (%p721_p11), %s138_s18, 128  }
  0x4e   : > { %509 = vsyncadd (%p721_p11), %s138_s18, 4294967168  ;;  %p722_p3 = scmp.ne.s32.totalorder %s714_s14, 0 }
  0x50   : > { %511 = dma.done.wait (%p722_p3), [#allocation5], 2176  }
  0x51   : > { %513 = vsyncadd (%p722_p3), [#allocation5], 4294965120  ;;  %p723_p6 = scmp.ne.s32.totalorder %s715_s15, 0 }
  0x52   : > { %v534_v0 = vmov (!%p723_p6), 0.0  }
  0x53   : > { %164 = sbr.rel (%p723_p6) target bundleno = 90 (0x5a), region = 40  ;;  %165 = vst [vmem:[%s709_s2] sm:$0xff] (!%p723_p6), %v534_v0 }
  0x5a PF: > { %v166_v1 = vld [vmem:[%s141_s24] sm:$0xff]  ;;  %v174_v2 = vld [vmem:[#allocation4] sm:$0xff]  ;;  %v175_v3 = vld [vmem:[#allocation4 + $0x8] sm:$0xff]  ;;  %s535_s16 = smov 64   ;;  %v536_v4 = vmov 0.0|0.0   ;;  %vm537_vm0 = vmmov 0   ;;  %v258_v15 = vlaneseq }
  0x5b   : > { %169 = vrot.lane.b32.xlu0 %v166_v1, %s535_s16  ;;  %364 = vmatprep.subr.bf16.mxu0 %v536_v4  ;;  %v365_v5 = vpack.c.bf16 %v175_v3, %v174_v2  ;;  %v538_v6 = vmov 0.0   ;;  %v176_v7 = vld [vmem:[#allocation4 + $0x10] sm:$0xff]  ;;  %v177_v8 = vld [vmem:[#allocation4 + $0x18] sm:$0xff]  ;;  %v167_v10 = vmul.f32 %v166_v1, %v166_v1  ;;  %vm172_vm1 = vcmask 523264   ;;  %s539_s14 = smov 112   ;;  %s541_s15 = smov 16  }
  0x5c   : > { %361 = vmatprep.mubr.msk.f32.mxu0 %vm537_vm0, %v538_v6  ;;  %v368_v9 = vpack.c.bf16 %v177_v8, %v176_v7  ;;  %v248_v16 = vld [vmem:[#allocation4 + $0x87] sm:$0x1]  ;;  %v259_v17 = vshrl.u32 %v258_v15, 7  ;;  %v540_v20 = vmov 0   ;;  %vm273_vm6 = vcmask 130048  }
  0x5d   : > { %366 = vmatpush3.bf16.xpose.msra.mxu0 %v365_v5  ;;  %vm249_vm2 = vcmp.gt.f32.partialorder %v248_v16, 0.5  ;;  %vm275_vm7 = vcmask 261120   ;;  %v283_v38 = vld [vmem:[%s709_s2] sm:$0x1]  ;;  %vm285_vm8 = vcmask 253952  }
  0x5e   : > { %367 = vmatprep.subr.bf16.mxu0 %v536_v4  ;;  %v260_v19 = vsub.s32 0, %v259_v17  ;;  %v257_v21 = vsel %vm249_vm2, 1, %v540_v20 }
  0x60   : > { %v261_v23 = vrot.slane %v257_v21, %v260_v19 }
  0x62   : > { %vm262_vm4 = vcmp.eq.s32.totalorder %v261_v23, 1 }
  0x65   : > { %369 = vmatpush3.bf16.xpose.msra.mxu0 %v368_v9 }
  0xcd   : > { %v170_v11 = vpop.permute.xlu0 %169 }
  0xce   : > { %v173_v12 = vsel %vm172_vm1, %v167_v10, %v170_v11 }
  0xcf   : > { %362 = vmatmul.mubr.f32.vlgmr.msra.gmra.mrb[0].mxu0 %v173_v12 }
 0x1a2   : > { %v244_v13 = vpop.f32.mrb[0].mxu0 }
 0x1a3   : > { %264 = vrot.lane.b32.xlu0 %v244_v13, %s539_s14  ;;  %v363_v14 = vpop.f32.mrb[1].mxu0  ;;  %430 = vrsqrt.f32 %v244_v13  ;;  %vm252_vm3 = vcmp.eq.f32.partialorder %v244_v13, inf  ;;  %v255_v25 = vand.u32 2147483648, %v244_v13  ;;  %vm254_vm5 = vcmp.eq.f32.partialorder %v244_v13, 0.0 }
 0x1ad   : > { %v431_v18 = vpop.eup %430 }
 0x1ae   : > { %v251_v22 = vmul.f32 %v431_v18, %v244_v13 }
 0x1b0   : > { %v253_v24 = vsel %vm252_vm3, %v244_v13, %v251_v22 }
 0x1b1   : > { %v256_v27 = vsel %vm254_vm5, %v255_v25, %v253_v24 }
 0x215   : > { %v265_v26 = vpop.permute.xlu0 %264 }
 0x216   : > { %v267_v28 = vsel %vm262_vm4, %v265_v26, %v256_v27 }
 0x217   : > { %v268_v29 = vmul.f32 %v267_v28, %v267_v28 }
 0x219   : > { %270 = vrot.lane.b32.xlu1 %v268_v29, %s541_s15 }
 0x28b   : > { %v271_v30 = vpop.permute.xlu1 %270 }
 0x28c   : > { %v274_v31 = vsel %vm273_vm6, %v267_v28, %v271_v30 }
 0x28d   : > { %v276_v32 = vsel %vm275_vm7, %v274_v31, 0.0 }
 0x28e   : > { %v277_v33 = vrot.slane %v276_v32, 4 }
 0x290   : > { %v278_v34 = vadd.f32 %v277_v33, %v276_v32 }
 0x292   : > { %v279_v35 = vrot.slane %v278_v34, 2 }
 0x294   : > { %v280_v36 = vadd.f32 %v279_v35, %v278_v34 }
 0x296   : > { %v281_v37 = vrot.slane %v280_v36, 1 }
 0x298   : > { %v282_v39 = vadd.f32 %v281_v37, %v280_v36 }
 0x29a   : > { %v284_v40 = vadd.f32 %v283_v38, %v282_v39 }
 0x29c   : > { %286 = vst.msk [vmem:[%s709_s2] sm:$0x1] %vm285_vm8, %v284_v40 }
 0x29d PF: > { %p13_p7 = scmp.ge.s32.totalorder %s606_s21, 6   ;;  %s724_s9 = smov %s520_s10 }
 0x29e   : > { %s725_s10 = smov %s524_s11  ;;  %s726_s11 = smov %s632_s8 }
 0x29f   : > { %s727_s12 = smov %s606_s21  ;;  %15 = sbr.rel (!%p13_p7) target bundleno = 4 (0x4), region = 72 }
 0x2a6   :  { %298 = vsyncpa [#allocation3], 1 }
 0x2a7   :  { %300 = vsyncpa [#allocation3 + $0x1], 1 }
 0x2a8   :  { %301 = vsyncpa [#allocation5], 1 }

// kernel: mini2d_so3_forward.3
= control target key start
LH: loop header
LB: loop body
LE: loop exit
PB: predicated region body
PF: predicated region fallthrough
CT: control target
= control target key end

     0   :  { %12 = vsyncpa [#allocation3], 0  ;;  %s3901_s0 = inlined_call_operand.vmem [shape: f32[32,64], index: 0, kind: input, shape index: {}]   ;;  %s3902_s1 = inlined_call_operand.vmem [shape: f32[32,1024], index: 1, kind: input, shape index: {}]   ;;  %s3903_s2 = inlined_call_operand.vmem [shape: f32[136,128], index: 2, kind: input, shape index: {}]   ;;  %s3904_s3 = inlined_call_operand.vmem [shape: f32[80,1024], index: 3, kind: input, shape index: {}]   ;;  %s3905_s4 = inlined_call_operand.vmem [shape: f32[8,128], index: 4, kind: input, shape index: {}]   ;;  %s3906_s5 = inlined_call_operand.hbm [shape: f32[32,64], index: 5, kind: output, shape index: {0}]   ;;  %s3907_s6 = inlined_call_operand.vmem [shape: f32[32,1024], index: 6, kind: output, shape index: {1}]  }
   0x1   :  { %14 = vsyncpa [#allocation3 + $0x1], 0  ;;  %s2616_s21 = smov 0   ;;  %s2618_s22 = smov 0  }
   0x2   :  { %s2620_s23 = smov 0   ;;  %s2622_s24 = smov 0  }
   0x3 LB: > { %s2637_s25 = sadd.s32 4294967295, %s2562_s24   ;;  %s2197_s26 = sadd.s32 4294967294, %s2562_s24   ;;  %s2562_s24 = sphi %s2622_s24, %s4046_s24   ;;  %s2558_s23 = sphi %s2620_s23, %s4045_s23   ;;  %s2554_s22 = sphi %s2618_s22, %s4044_s22   ;;  %s2550_s21 = sphi %s2616_s21, %s4043_s21  }
   0x4   : > { %s2641_s27 = sadd.s32 1, %s2562_s24   ;;  %s142_s28 = sadd.s32 1, %s2558_s23 }
   0x5   : > { %s139_s29 = ssub.s32 %s2562_s24, %s2641_s27  ;;  %p152_p0 = scmp.ne.s32.totalorder %s2558_s23, %s2554_s22 }
   0x6   : > { %p140_p1 = scmp.eq.s32.totalorder %s139_s29, 0  ;;  %p153_p2 = scmp.eq.s32.totalorder %s2637_s25, 3 }
   0x7   : > { %p158_p3 = scmp.ne.s32.totalorder %s2554_s22, %s2550_s21  ;;  %p159_p4 = scmp.eq.s32.totalorder %s2197_s26, 3 }
   0x8   : > { %s2652_s30 = scalar_select %p140_p1, %s2558_s23, %s142_s28  }
   0x9   : > { %p2654_p5 = por %p153_p2, %p152_p0  ;;  %p2658_p6 = por %p159_p4, %p158_p3 }
   0xa   : > { %p2200_p7 = scmp.ge.s32.totalorder %s2562_s24, 1  ;;  %p227_p8 = scmp.lt.s32.totalorder %s2562_s24, 5 }
   0xc   : > { %p228_p9 = pnand %p2200_p7, %p227_p8 }
   0xe   : > { %231 = sbr.rel (%p228_p9) target bundleno = 2195 (0x893), region = 40 }
  0x15   : > { %p266_p10 = scmp.lt.s32.totalorder %s2637_s25, 3  ;;  %v289_v0 = vld [vmem:[%s3903_s2] sm:$0xff]  ;;  %v290_v1 = vld [vmem:[%s3903_s2 + $0x8] sm:$0xff]  ;;  %v2564_v2 = vmov 0.0|0.0   ;;  %vm2565_vm0 = vmmov 0   ;;  %v2566_v4 = vmov 0.0   ;;  %v3910_v18 = vlaneseq }
  0x16   : > { %2330 = vmatprep.subr.bf16.mxu0 %v2564_v2  ;;  %v2672_v3 = vpack.c.bf16 %v290_v1, %v289_v0  ;;  %2336 = vmatprep.subr.bf16.mxu1 %v2564_v2  ;;  %v291_v5 = vld [vmem:[%s3903_s2 + $0x10] sm:$0xff]  ;;  %v292_v6 = vld [vmem:[%s3903_s2 + $0x18] sm:$0xff]  ;;  %s2567_s28 = smov 64   ;;  %vm396_vm1 = vcmask 523264   ;;  %v3911_v12 = vmov 0   ;;  %v301_v13 = vld [vmem:[%s3903_s2 + $0x60] sm:$0xff] }
  0x17   : > { %s2676_s13 = scalar_select %p266_p10, %s2637_s25, 3  ;;  %2283 = vmatprep.mubr.msk.f32.mxu0 %vm2565_vm0, %v2566_v4  ;;  %2290 = vmatprep.mubr.msk.f32.mxu1 %vm2565_vm0, %v2566_v4  ;;  %v2698_v8 = vpack.c.bf16 %v292_v6, %v291_v5  ;;  %v302_v14 = vld [vmem:[%s3903_s2 + $0x68] sm:$0xff]  ;;  %v468_v19 = vld [vmem:[%s3903_s2 + $0x87] sm:$0x1]  ;;  %v2719_v20 = vshrl.u32 %v3910_v18, 7  ;;  %vm505_vm6 = vcmask 130048  }
  0x18   : > { %2332 = vmatpush3.bf16.xpose.msra.mxu0 %v2672_v3  ;;  %2479 = vset.pattern.permute.xlu0 %v3911_v12  ;;  %v2337_v15 = vpack.c.bf16 %v302_v14, %v301_v13  ;;  %s2569_s12 = smov 112   ;;  %vm469_vm2 = vcmp.gt.f32.partialorder %v468_v19, 0.5  ;;  %v2215_v28 = vld [vmem:[%s3905_s4] ss:$0 sm:$0xff]  ;;  %v2216_v31 = vld [vmem:[%s3905_s4 + $0x1] ss:$0 sm:$0xff] }
  0x19   : > { %s2202_s14 = sshll.u32 %s2676_s13, 3  ;;  %2333 = vmatprep.subr.bf16.mxu0 %v2564_v2  ;;  %v2722_v22 = vsub.s32 0, %v2719_v20  ;;  %v477_v23 = vsel %vm469_vm2, 1, %v3911_v12  ;;  %v303_v35 = vld [vmem:[%s3903_s2 + $0x70] sm:$0xff]  ;;  %v304_v36 = vld [vmem:[%s3903_s2 + $0x78] sm:$0xff]  ;;  %v293_v47 = vld [vmem:[%s3903_s2 + $0x20] sm:$0xff] }
  0x1a   : > { %s269_s26 = scalar_lea.vmem %s3901_s0, %s2202_s14  ;;  %2338 = vmatpush3.bf16.msra.mxu1 %v2337_v15  ;;  %v2340_v37 = vpack.c.bf16 %v304_v36, %v303_v35  ;;  %v2217_v38 = vld [vmem:[%s3903_s2 + $0x80] ss:$0 sm:$0xff]  ;;  %v294_v48 = vld [vmem:[%s3903_s2 + $0x28] sm:$0xff]  ;;  %v295_v49 = vld [vmem:[%s3903_s2 + $0x30] sm:$0xff]  ;;  %s2570_s14 = smov 16   ;;  %vm668_vm7 = vcmask 261120  }
  0x1b   : > { %v2694_v7 = vld [vmem:[%s269_s26] sm:$0xff]  ;;  %2339 = vmatprep.subr.bf16.mxu1 %v2564_v2  ;;  %v481_v25 = vrot.slane %v477_v23, %v2722_v22  ;;  %v2349_v50 = vpack.c.bf16 %v294_v48, %v293_v47  ;;  %v296_v51 = vld [vmem:[%s3903_s2 + $0x38] sm:$0xff]  ;;  %v298_v54 = vld [vmem:[%s3903_s2 + $0x48] sm:$0xff]  ;;  %s2248_s15 = sshll.u32 %s2676_s13, 6  ;;  %vm1361_vm8 = vcmask 7168   ;;  %vm1363_vm9 = vcmask 15360  }
  0x1c   : > { %393 = vrot.lane.b32.xlu0 %v2694_v7, %s2567_s28  ;;  %v391_v9 = vmul.f32 %v2694_v7, %v2694_v7  ;;  %v2352_v52 = vpack.c.bf16 %v296_v51, %v295_v49  ;;  %v297_v53 = vld [vmem:[%s3903_s2 + $0x40] sm:$0xff]  ;;  %v299_v1 = vld [vmem:[%s3903_s2 + $0x50] sm:$0xff]  ;;  %v312_v5 = vld [vmem:[%s3904_s3 + $0x8] sm:$0xff]  ;;  %s3033_s9 = scalar_lea.vmem %s3902_s1, %s2248_s15  ;;  %vm1365_vm10 = vcmask 23552   ;;  %s2576_s10 = smov 127  }
  0x1d   : > { %vm482_vm4 = vcmp.eq.s32.totalorder %v481_v25, 1  ;;  %v2220_v55 = vld [vmem:[%s3903_s2 + $0x81] ss:$0 sm:$0xff]  ;;  %v2355_v56 = vpack.c.bf16 %v298_v54, %v297_v53  ;;  %v320_v6 = vld [vmem:[%s3904_s3 + $0x48] sm:$0xff]  ;;  %v313_v36 = vld [vmem:[%s3904_s3 + $0x10] sm:$0xff]  ;;  %s2579_s16 = smov 3  }
  0x1e   : > { %v319_v13 = vld [vmem:[%s3904_s3 + $0x40] sm:$0xff]  ;;  %v344_v25 = vld [vmem:[%s3904_s3 + $0x108] sm:$0xff]  ;;  %v337_v47 = vld [vmem:[%s3904_s3 + $0xd0] sm:$0xff]  ;;  %s3993_s29 = sand.u32 1, %s2554_s22  }
  0x1f   : > { %v335_v23 = vld [vmem:[%s3904_s3 + $0xc0] sm:$0xff]  ;;  %v346_v48 = vld [vmem:[%s3904_s3 + $0x118] sm:$0xff]  ;;  %v345_v51 = vld [vmem:[%s3904_s3 + $0x110] sm:$0xff] }
  0x20   : > { %2335 = vmatpush3.bf16.xpose.msra.mxu0 %v2698_v8  ;;  %v367_v35 = vld [vmem:[%s3904_s3 + $0x1c0] sm:$0xff]  ;;  %v362_v53 = vld [vmem:[%s3904_s3 + $0x198] sm:$0xff] }
  0x21   : > { %2348 = vmatprep.subr.bf16.mxu0 %v2564_v2  ;;  %v370_v54 = vld [vmem:[%s3904_s3 + $0x1d8] sm:$0xff] }
  0x8e   : > { %v394_v10 = vpop.permute.xlu0 %393 }
  0x8f   : > { %v397_v11 = vsel %vm396_vm1, %v391_v9, %v394_v10  ;;  %v2360_v9 = vpack.c.bf16 %v320_v6, %v312_v5  ;;  %v322_v10 = vld [vmem:[%s3904_s3 + $0x58] sm:$0xff]  ;;  %v317_v5 = vld [vmem:[%s3904_s3 + $0x30] sm:$0xff] }
  0x90   : > { %2284 = vmatmul.mubr.f32.vlgmr.msra.gmra.mrb[0].mxu0 %v397_v11  ;;  %v311_v11 = vld [vmem:[%s3904_s3] sm:$0xff]  ;;  %v325_v6 = vld [vmem:[%s3904_s3 + $0x70] sm:$0xff] }
  0x91   : > { %2327 = vmatprep.mubr.msk.f32.mxu0 %vm2565_vm0, %v2566_v4  ;;  %2350 = vmatpush3.bf16.msra.mxu0 %v2349_v50  ;;  %v2362_v15 = vpack.c.bf16 %v319_v13, %v311_v11  ;;  %v342_v11 = vld [vmem:[%s3904_s3 + $0xf8] sm:$0xff] }
  0x92   : > { %2351 = vmatprep.subr.bf16.mxu0 %v2564_v2 }
  0x95   : > { %2353 = vmatpush3.bf16.msra.mxu0 %v2352_v52  ;;  %v353_v52 = vld [vmem:[%s3904_s3 + $0x150] sm:$0xff] }
  0x96   : > { %2354 = vmatprep.subr.bf16.mxu0 %v2564_v2 }
  0x99   : > { %2356 = vmatpush3.bf16.msra.mxu0 %v2355_v56  ;;  %v2388_v56 = vpack.c.bf16 %v370_v54, %v362_v53  ;;  %v2208_v53 = vld [vmem:[%s3904_s3 + $0x207] ss:$8 sm:$0xf0]  ;;  %v2209_v54 = vld [vmem:[%s3904_s3 + $0x240] ss:$8 sm:$0xf] }
  0x9a   : > { %2357 = vmatprep.subr.bf16.mxu0 %v2564_v2 }
 0x163   : > { %v464_v16 = vpop.f32.mrb[0].mxu0 }
 0x164   : > { %484 = vrot.lane.b32.xlu0 %v464_v16, %s2569_s12  ;;  %v2285_v17 = vpop.f32.mrb[1].mxu0  ;;  %2488 = vrsqrt.f32 %v464_v16  ;;  %vm472_vm3 = vcmp.eq.f32.partialorder %v464_v16, inf  ;;  %v475_v27 = vand.u32 2147483648, %v464_v16  ;;  %vm474_vm5 = vcmp.eq.f32.partialorder %v464_v16, 0.0  ;;  %s3908_s12 = sand.u32 1, %s2554_s22  }
 0x165   : > { %v336_v17 = vld [vmem:[%s3904_s3 + $0xc8] sm:$0xff]  ;;  %s2907_s20 = sshll.u32 %s3908_s12, 3  ;;  %s2572_s12 = smov 125  }
 0x166   : > { %s3909_s11 = scalar_lea.vmem [#allocation2], %s2907_s20  ;;  %s3992_s19 = scalar_lea.vmem [#allocation2], %s2907_s20 }
 0x167   : > { %s2098_s26 = sshll.u32 %s3992_s19, 4  ;;  %s2099_s26 = int_to_ptr.vmem [resolvable:$true] %s2098_s26 }
 0x16e   : > { %v2489_v21 = vpop.eup %2488 }
 0x16f   : > { %v471_v24 = vmul.f32 %v2489_v21, %v464_v16  ;;  %v327_v21 = vld [vmem:[%s3904_s3 + $0x80] sm:$0xff] }
 0x171   : > { %v473_v26 = vsel %vm472_vm3, %v464_v16, %v471_v24  ;;  %v328_v16 = vld [vmem:[%s3904_s3 + $0x88] sm:$0xff]  ;;  %v2366_v24 = vpack.c.bf16 %v335_v23, %v327_v21  ;;  %v331_v23 = vld [vmem:[%s3904_s3 + $0xa0] sm:$0xff] }
 0x172   : > { %v476_v30 = vsel %vm474_vm5, %v475_v27, %v473_v26  ;;  %v2364_v19 = vpack.c.bf16 %v336_v17, %v328_v16  ;;  %v352_v26 = vld [vmem:[%s3904_s3 + $0x148] sm:$0xff] }
 0x173   : > { %v2368_v27 = vpack.c.bf16 %v352_v26, %v344_v25  ;;  %v333_v25 = vld [vmem:[%s3904_s3 + $0xb0] sm:$0xff] }
 0x1d6   : > { %v485_v29 = vpop.permute.xlu0 %484 }
 0x1d7   : > { %v487_v32 = vsel %vm482_vm4, %v485_v29, %v476_v30  ;;  %v351_v29 = vld [vmem:[%s3904_s3 + $0x140] sm:$0xff] }
 0x1d8   : > { %v492_v33 = vmul.f32 %v2215_v28, %v487_v32  ;;  %v498_v60 = vand.u32 2147483647, %v487_v32  ;;  %v343_v28 = vld [vmem:[%s3904_s3 + $0x100] sm:$0xff]  ;;  %v368_v32 = vld [vmem:[%s3904_s3 + $0x1c8] sm:$0xff] }
 0x1d9   : > { %v2370_v30 = vpack.c.bf16 %v351_v29, %v343_v28  ;;  %v348_v28 = vld [vmem:[%s3904_s3 + $0x128] sm:$0xff] }
 0x1da   : > { %v497_v34 = vadd.f32 %v2216_v31, %v492_v33  ;;  %v499_v61 = vadd.f32 0.01, %v498_v60  ;;  %v360_v31 = vld [vmem:[%s3904_s3 + $0x188] sm:$0xff] }
 0x1db   : > { %v2372_v33 = vpack.c.bf16 %v368_v32, %v360_v31  ;;  %v316_v60 = vld [vmem:[%s3904_s3 + $0x28] sm:$0xff]  ;;  %v358_v31 = vld [vmem:[%s3904_s3 + $0x178] sm:$0xff] }
 0x1dc   : > { %2291 = vmatmul.mubr.msk.f32.vlgmr.msra.gmra.mrb[0].mxu1 %vm505_vm6, %v497_v34  ;;  %v359_v34 = vld [vmem:[%s3904_s3 + $0x180] sm:$0xff]  ;;  %v356_v29 = vld [vmem:[%s3904_s3 + $0x168] sm:$0xff] }
 0x1dd   : > { %2297 = vmatprep.mubr.msk.f32.mxu1 %vm2565_vm0, %v2566_v4  ;;  %2341 = vmatpush3.bf16.msra.mxu1 %v2340_v37  ;;  %v321_v37 = vld [vmem:[%s3904_s3 + $0x50] sm:$0xff] }
 0x1de   : > { %2342 = vmatprep.subr.bf16.mxu1 %v2564_v2 }
 0x2af   : > { %v575_v39 = vpop.f32.mrb[0].mxu1 }
 0x2b0   : > { %v576_v40 = vadd.f32 %v2217_v38, %v575_v39  ;;  %v2292_v41 = vpop.f32.mrb[1].mxu1  ;;  %v330_v38 = vld [vmem:[%s3904_s3 + $0x98] sm:$0xff] }
 0x2b1   : > { %v338_v39 = vld [vmem:[%s3904_s3 + $0xd8] sm:$0xff] }
 0x2b2   : > { %v2219_v42 = vmul.f32 -1.442695, %v576_v40 }
 0x2b4   : > { %2490 = vpow2.f32 %v2219_v42  ;;  %v2378_v42 = vpack.c.bf16 %v321_v37, %v313_v36  ;;  %v355_v36 = vld [vmem:[%s3904_s3 + $0x160] sm:$0xff]  ;;  %v349_v37 = vld [vmem:[%s3904_s3 + $0x130] sm:$0xff] }
 0x2be   : > { %v2491_v43 = vpop.eup %2490 }
 0x2bf   : > { %v582_v44 = vadd.f32 1.0, %v2491_v43 }
 0x2c1   : > { %2492 = vrcp.f32 %v582_v44 }
 0x2c2   : > { %2494 = vrcp.f32 %v499_v61  ;;  %v324_v61 = vld [vmem:[%s3904_s3 + $0x68] sm:$0xff] }
 0x2cb   : > { %v2493_v45 = vpop.eup %2492 }
 0x2cc   : > { %v585_v46 = vmul.f32 %v2493_v45, %v576_v40  ;;  %v2495_v62 = vpop.eup %2494  ;;  %v2374_v40 = vpack.c.bf16 %v367_v35, %v359_v34  ;;  %v2380_v45 = vpack.c.bf16 %v338_v39, %v330_v38  ;;  %v2400_v34 = vpack.c.bf16 %v356_v29, %v348_v28  ;;  %v347_v35 = vld [vmem:[%s3904_s3 + $0x120] sm:$0xff]  ;;  %v357_v39 = vld [vmem:[%s3904_s3 + $0x170] sm:$0xff] }
 0x2ce   : > { %2298 = vmatmul.mubr.msk.f32.vlgmr.msra.gmra.mrb[2].mxu1 %vm505_vm6, %v585_v46  ;;  %v329_v46 = vld [vmem:[%s3904_s3 + $0x90] sm:$0xff] }
 0x2cf   : > { %2344 = vmatpush3.bf16.msra.mxu1 %v2672_v3  ;;  %2308 = vmatprep.mubr.msk.f32.mxu1 %vm2565_vm0, %v2566_v4  ;;  %v300_v3 = vld [vmem:[%s3903_s2 + $0x58] sm:$0xff]  ;;  %v2382_v49 = vpack.c.bf16 %v337_v47, %v329_v46  ;;  %v363_v47 = vld [vmem:[%s3904_s3 + $0x1a0] sm:$0xff] }
 0x2d0   : > { %2345 = vmatprep.subr.bf16.mxu1 %v2564_v2  ;;  %v2358_v2 = vpack.c.bf16 %v300_v3, %v299_v1  ;;  %v315_v3 = vld [vmem:[%s3904_s3 + $0x20] sm:$0xff] }
 0x2d2   : > { %2359 = vmatpush3.bf16.msra.mxu0 %v2358_v2  ;;  %v323_v2 = vld [vmem:[%s3904_s3 + $0x60] sm:$0xff] }
 0x2d3   : > { %2347 = vmatpush3.bf16.msra.mxu1 %v2698_v8  ;;  %v314_v8 = vld [vmem:[%s3904_s3 + $0x18] sm:$0xff] }
 0x2d4   : > { %v2376_v14 = vpack.c.bf16 %v322_v10, %v314_v8  ;;  %2361 = vmatprep.subr.bf16.mxu1 %v2360_v9  ;;  %v332_v8 = vld [vmem:[%s3904_s3 + $0xa8] sm:$0xff]  ;;  %v334_v10 = vld [vmem:[%s3904_s3 + $0xb8] sm:$0xff] }
 0x2d5   : > { %v340_v9 = vld [vmem:[%s3904_s3 + $0xe8] sm:$0xff]  ;;  %v2412_v26 = vpack.c.bf16 %v342_v11, %v334_v10 }
 0x2d6   : > { %2377 = vmatprep.subr.bf16.mxu0 %v2376_v14  ;;  %v2396_v21 = vpack.c.bf16 %v340_v9, %v332_v8  ;;  %v3061_v8 = vld [vmem:[%s3033_s9 + $0x10] sm:$0xff]  ;;  %v3064_v9 = vld [vmem:[%s3033_s9 + $0x8] sm:$0xff] }
 0x3a1   : > { %v659_v57 = vpop.f32.mrb[2].mxu1 }
 0x3a2   : > { %v660_v58 = vadd.f32 %v2220_v55, %v659_v57  ;;  %v2299_v59 = vpop.f32.mrb[3].mxu1  ;;  %v2386_v55 = vpack.c.bf16 %v353_v52, %v345_v51  ;;  %v361_v57 = vld [vmem:[%s3904_s3 + $0x190] sm:$0xff] }
 0x3a3   : > { %v2207_v52 = vld [vmem:[%s3904_s3 + $0x207] ss:$8 sm:$0xf] }
 0x3a4   : > { %664 = vrot.lane.b32.xlu1 %v660_v58, %s2570_s14  ;;  %v369_v58 = vld [vmem:[%s3904_s3 + $0x1d0] sm:$0xff]  ;;  %s2578_s14 = smov 2  }
 0x3a5   : > { %v2390_v59 = vpack.c.bf16 %v369_v58, %v361_v57  ;;  %v2212_v57 = vld [vmem:[%s3904_s3 + $0x241] ss:$8 sm:$0xf0]  ;;  %v2213_v58 = vld [vmem:[%s3904_s3 + $0x242] ss:$8 sm:$0xf] }
 0x416   : > { %v665_v63 = vpop.permute.xlu1 %664 }
 0x417   : > { %v667_v0 = vsel %vm505_vm6, %v2495_v62, %v665_v63  ;;  %v318_v62 = vld [vmem:[%s3904_s3 + $0x38] sm:$0xff]  ;;  %v2392_v63 = vpack.c.bf16 %v324_v61, %v316_v60  ;;  %v3035_v60 = vor.u32 %v2208_v53, %v2207_v52 }
 0x418   : > { %2309 = vmatmul.mubr.msk.f32.vlgmr.msra.gmra.mrb[4].mxu1 %vm668_vm7, %v667_v0  ;;  %v326_v0 = vld [vmem:[%s3904_s3 + $0x78] sm:$0xff] }
 0x419   : > { %889 = vmatprep.mubr.f32.mxu1 %v2566_v4  ;;  %2363 = vmatpush1.bf16.msra.mxu1 %v2362_v15  ;;  %v2408_v1 = vpack.c.bf16 %v326_v0, %v318_v62  ;;  %v2394_v15 = vpack.c.bf16 %v323_v2, %v315_v3  ;;  %v3044_v0 = vsub.s32 2, %v2719_v20  ;;  %v3050_v3 = vsub.s32 1, %v2719_v20 }
 0x41a   : > { %2365 = vmatprep.subr.bf16.mxu1 %v2364_v19  ;;  %v2410_v19 = vpack.c.bf16 %v325_v6, %v317_v5  ;;  %v3054_v5 = vrot.slane %v3035_v60, %v2722_v22 }
 0x41c   : > { %3954 = vst [vmem:[#allocation5_spill] sm:$0xff] %v3054_v5 }
 0x41d   : > { %2367 = vmatpush1.bf16.msra.mxu1 %v2366_v24  ;;  %v339_v24 = vld [vmem:[%s3904_s3 + $0xe0] sm:$0xff] }
 0x41e   : > { %2369 = vmatprep.subr.bf16.mxu1 %v2368_v27  ;;  %v341_v27 = vld [vmem:[%s3904_s3 + $0xf0] sm:$0xff]  ;;  %v2398_v32 = vpack.c.bf16 %v339_v24, %v331_v23 }
 0x421   : > { %2371 = vmatpush1.bf16.msra.mxu1 %v2370_v30  ;;  %v350_v30 = vld [vmem:[%s3904_s3 + $0x138] sm:$0xff] }
 0x422   : > { %2373 = vmatprep.subr.bf16.mxu1 %v2372_v33  ;;  %v2414_v33 = vpack.c.bf16 %v341_v27, %v333_v25  ;;  %v2416_v38 = vpack.c.bf16 %v358_v31, %v350_v30  ;;  %v3105_v30 = vrot.slane %v3035_v60, %v3050_v3 }
 0x424   : > { %3962 = vst [vmem:[#allocation13_spill] sm:$0xff] %v3105_v30 }
 0x425   : > { %2375 = vmatpush1.bf16.msra.mxu1 %v2374_v40  ;;  %v364_v40 = vld [vmem:[%s3904_s3 + $0x1a8] sm:$0xff] }
 0x426   : > { %2393 = vmatprep.subr.bf16.mxu1 %v2392_v63 }
 0x4eb   : > { %v738_v41 = vpop.f32.mrb[4].mxu1 }
 0x4ec   : > { %v742_v43 = vmul.f32 %v738_v41, %v2694_v7  ;;  %817 = vrot.lane.b32.xlu1 %v738_v41, %s2567_s28  ;;  %v2310_v44 = vpop.f32.mrb[5].mxu1  ;;  %v354_v7 = vld [vmem:[%s3904_s3 + $0x158] sm:$0xff]  ;;  %v372_v41 = vld [vmem:[%s3904_s3 + $0x1e8] sm:$0xff] }
 0x4ed   : > { %v2384_v50 = vpack.c.bf16 %v354_v7, %v346_v48  ;;  %v2402_v44 = vpack.c.bf16 %v355_v36, %v347_v35  ;;  %v2404_v46 = vpack.c.bf16 %v372_v41, %v364_v40  ;;  %v371_v48 = vld [vmem:[%s3904_s3 + $0x1e0] sm:$0xff] }
 0x4ee   : > { %2328 = vmatmul.mubr.msk.f32.vlgmr.msra.gmra.mrb[2].mxu0 %vm396_vm1, %v742_v43  ;;  %v374_v43 = vld [vmem:[%s3904_s3 + $0x1f8] sm:$0xff] }
 0x4ef   : > { %2379 = vmatpush1.bf16.msra.mxu0 %v2378_v42  ;;  %960 = vmatprep.mubr.f32.mxu0 %v2566_v4  ;;  %v366_v42 = vld [vmem:[%s3904_s3 + $0x1b8] sm:$0xff] }
 0x4f0   : > { %2381 = vmatprep.subr.bf16.mxu0 %v2380_v45  ;;  %v2418_v45 = vpack.c.bf16 %v357_v39, %v349_v37  ;;  %v2420_v7 = vpack.c.bf16 %v374_v43, %v366_v42 }
 0x4f3   : > { %2383 = vmatpush1.bf16.msra.mxu0 %v2382_v49  ;;  %v373_v49 = vld [vmem:[%s3904_s3 + $0x1f0] sm:$0xff] }
 0x4f4   : > { %2385 = vmatprep.subr.bf16.mxu0 %v2384_v50  ;;  %v2406_v50 = vpack.c.bf16 %v371_v48, %v363_v47 }
 0x4f7   : > { %2387 = vmatpush1.bf16.msra.mxu0 %v2386_v55  ;;  %v2210_v55 = vld [vmem:[%s3904_s3 + $0x240] ss:$8 sm:$0xf0] }
 0x4f8   : > { %2389 = vmatprep.subr.bf16.mxu0 %v2388_v56  ;;  %v2211_v56 = vld [vmem:[%s3904_s3 + $0x241] ss:$8 sm:$0xf]  ;;  %v3037_v61 = vor.u32 %v2210_v55, %v2209_v54 }
 0x4f9   : > { %v3039_v62 = vor.u32 %v2212_v57, %v2211_v56 }
 0x4fa   : > { %v3058_v6 = vrot.slane %v3037_v61, %v2722_v22 }
 0x4fb   : > { %2391 = vmatpush1.bf16.msra.mxu0 %v2390_v59  ;;  %v2214_v59 = vld [vmem:[%s3904_s3 + $0x242] ss:$8 sm:$0xf0]  ;;  %v3068_v11 = vrot.slane %v3039_v62, %v2722_v22  ;;  %v3088_v23 = vrot.slane %v3039_v62, %v3044_v0 }
 0x4fc   : > { %2409 = vmatprep.subr.bf16.mxu0 %v2408_v1  ;;  %v3041_v63 = vor.u32 %v2214_v59, %v2213_v58  ;;  %v3047_v1 = vld [vmem:[%s3033_s9] sm:$0xff]  ;;  %3955 = vst [vmem:[#allocation6_spill] sm:$0xff] %v3058_v6 }
 0x4fd   : > { %3956 = vst [vmem:[#allocation7_spill] sm:$0xff] %v3068_v11  ;;  %3960 = vst [vmem:[#allocation11_spill] sm:$0xff] %v3088_v23 }
 0x4fe   : > { %v3092_v24 = vrot.slane %v3041_v63, %v3044_v0 }
 0x500   : > { %3961 = vst [vmem:[#allocation12_spill] sm:$0xff] %v3092_v24 }
 0x55e   : > { %v818_v13 = vpop.permute.xlu1 %817 }
 0x5c1   : > { %v812_v14 = vpop.f32.mrb[2].mxu0 }
 0x5c2   : > { %v2924_v16 = vmul.f32 %v818_v13, %v812_v14  ;;  %v2329_v17 = vpop.f32.mrb[3].mxu0  ;;  %v3072_v13 = vrot.slane %v3041_v63, %v2722_v22  ;;  %v3076_v14 = vrot.slane %v3035_v60, %v3044_v0 }
 0x5c4   : > { %1109 = vrot.lane.b32.xlu0 %v2924_v16, %s2567_s28  ;;  %2224 = vmatmul.mubr.msk.f32.vlgmr.msra.gmra.mrb[6].mxu1 %vm396_vm1, %v2924_v16  ;;  %821 = vst.msk [vmem:[%s3909_s11] sm:$0xff] %vm396_vm1, %v2924_v16  ;;  %3957 = vst [vmem:[#allocation8_spill] sm:$0xff] %v3072_v13  ;;  %s2575_s11 = smov 126   ;;  %s2577_s28 = smov 1  }
 0x5c5   : > { %2225 = vmatmul.mubr.msk.f32.vlgmr.msra.gmra.mrb[4].mxu0 %vm396_vm1, %v2924_v16  ;;  %2395 = vmatpush1.bf16.msra.mxu1 %v2394_v15  ;;  %3958 = vst [vmem:[#allocation9_spill] sm:$0xff] %v3076_v14  ;;  %v3079_v15 = vsub.s32 3, %v2719_v20 }
 0x5c6   : > { %2411 = vmatpush1.bf16.msra.mxu0 %v2410_v19  ;;  %2397 = vmatprep.subr.bf16.mxu1 %v2396_v21  ;;  %v3084_v21 = vrot.slane %v3037_v61, %v3044_v0 }
 0x5c7   : > { %2413 = vmatprep.subr.bf16.mxu0 %v2412_v26  ;;  %1031 = vmatprep.mubr.f32.mxu1 %v2566_v4  ;;  %v3095_v26 = vld [vmem:[%s3033_s9 + $0x18] sm:$0xff] }
 0x5c8   : > { %1102 = vmatprep.mubr.f32.mxu0 %v2566_v4  ;;  %v365_v4 = vld [vmem:[%s3904_s3 + $0x1b0] sm:$0xff]  ;;  %3959 = vst [vmem:[#allocation10_spill] sm:$0xff] %v3084_v21 }
 0x5c9   : > { %2399 = vmatpush1.bf16.msra.mxu1 %v2398_v32  ;;  %v2422_v51 = vpack.c.bf16 %v373_v49, %v365_v4 }
 0x5ca   : > { %2415 = vmatpush1.bf16.msra.mxu0 %v2414_v33  ;;  %2401 = vmatprep.subr.bf16.mxu1 %v2400_v34  ;;  %v3110_v33 = vrot.slane %v3037_v61, %v3050_v3  ;;  %v3114_v34 = vrot.slane %v3039_v62, %v3050_v3 }
 0x5cb   : > { %2417 = vmatprep.subr.bf16.mxu0 %v2416_v38  ;;  %v3125_v38 = vrot.slane %v3035_v60, %v3079_v15 }
 0x5cc   : > { %3963 = vst [vmem:[#allocation14_spill] sm:$0xff] %v3110_v33  ;;  %3964 = vst [vmem:[#allocation15_spill] sm:$0xff] %v3114_v34 }
 0x5cd   : > { %2403 = vmatpush1.bf16.msra.mxu1 %v2402_v44  ;;  %3966 = vst [vmem:[#allocation17_spill] sm:$0xff] %v3125_v38  ;;  %v3134_v44 = vrot.slane %v3037_v61, %v3079_v15 }
 0x5ce   : > { %2419 = vmatpush1.bf16.msra.mxu0 %v2418_v45  ;;  %2405 = vmatprep.subr.bf16.mxu1 %v2404_v46  ;;  %v3138_v45 = vrot.slane %v3039_v62, %v3079_v15  ;;  %v3142_v46 = vrot.slane %v3041_v63, %v3079_v15 }
 0x5cf   : > { %2421 = vmatprep.subr.bf16.mxu0 %v2420_v7  ;;  %3967 = vst [vmem:[#allocation18_spill] sm:$0xff] %v3134_v44 }
 0x5d0   : > { %3968 = vst [vmem:[#allocation19_spill] sm:$0xff] %v3138_v45  ;;  %3969 = vst [vmem:[#allocation20_spill] sm:$0xff] %v3142_v46 }
 0x5d1   : > { %2407 = vmatpush1.bf16.msra.mxu1 %v2406_v50 }
 0x5d2   : > { %2423 = vmatpush1.bf16.msra.mxu0 %v2422_v51 }
 0x5d4   : > { %2226 = vmatmul.mubr.msk.f32.vlgmr.msra.gmra.mrb[8].mxu1 %vm396_vm1, %v2924_v16 }
 0x5d5   : > { %2227 = vmatmul.mubr.msk.f32.vlgmr.msra.gmra.mrb[6].mxu0 %vm396_vm1, %v2924_v16 }
 0x636   : > { %v1110_v2 = vpop.permute.xlu0 %1109 }
 0x637   : > { %v3099_v27 = vsel %vm396_vm1, %v2924_v16, %v1110_v2  ;;  %v3118_v16 = vrot.slane %v3041_v63, %v3050_v3 }
 0x639   : > { %3965 = vst [vmem:[#allocation16_spill] sm:$0xff] %v3118_v16 }
 0x697   : > { %v891_v10 = vpop.f32.mrb[6].mxu1 }
 0x698   : > { %v1113_v17 = vmul.f32 %v891_v10, %v3047_v1  ;;  %v962_v19 = vpop.f32.mrb[4].mxu0  ;;  %v893_v25 = vpop.f32.mrb[7].mxu1 }
 0x699   : > { %v1115_v28 = vmul.f32 %v962_v19, %v3061_v8  ;;  %v1114_v29 = vmul.f32 %v893_v25, %v3064_v9  ;;  %v964_v31 = vpop.f32.mrb[5].mxu0 }
 0x69a   : > { %v1121_v32 = vmul.f32 %v1113_v17, %v3099_v27  ;;  %v1116_v37 = vmul.f32 %v964_v31, %v3095_v26 }
 0x69b   : > { %v1123_v35 = vmul.f32 %v1115_v28, %v3099_v27  ;;  %v1122_v36 = vmul.f32 %v1114_v29, %v3099_v27  ;;  %v3157_v28 = vsub.s32 4, %v2719_v20  ;;  %v3160_v29 = vsub.s32 6, %v2719_v20 }
 0x69c   : > { %v1170_v39 = vmul.f32 %v3054_v5, %v1121_v32  ;;  %v1228_v40 = vmul.f32 %v3058_v6, %v1121_v32  ;;  %v1286_v41 = vmul.f32 %v3068_v11, %v1121_v32  ;;  %v1344_v42 = vmul.f32 %v3072_v13, %v1121_v32 }
 0x69d   : > { %v1172_v43 = vmul.f32 %v3076_v14, %v1123_v35  ;;  %v1171_v47 = vmul.f32 %v3105_v30, %v1122_v36  ;;  %v1229_v48 = vmul.f32 %v3110_v33, %v1122_v36  ;;  %v1287_v7 = vmul.f32 %v3114_v34, %v1122_v36 }
 0x69e   : > { %v1345_v4 = vmul.f32 %v3118_v16, %v1122_v36  ;;  %v1230_v49 = vmul.f32 %v3084_v21, %v1123_v35  ;;  %v1288_v50 = vmul.f32 %v3088_v23, %v1123_v35  ;;  %v1346_v51 = vmul.f32 %v3092_v24, %v1123_v35 }
 0x69f   : > { %v1124_v52 = vmul.f32 %v1116_v37, %v3099_v27  ;;  %v1178_v53 = vadd.f32 %v1171_v47, %v1170_v39  ;;  %v1236_v54 = vadd.f32 %v1229_v48, %v1228_v40  ;;  %v1294_v55 = vadd.f32 %v1287_v7, %v1286_v41  ;;  %v3163_v37 = vld [vmem:[%s3033_s9 + $0x20] sm:$0xff]  ;;  %v3169_v40 = vld [vmem:[%s3033_s9 + $0x30] sm:$0xff]  ;;  %v3172_v41 = vld [vmem:[%s3033_s9 + $0x28] sm:$0xff] }
 0x6a0   : > { %v1352_v56 = vadd.f32 %v1345_v4, %v1344_v42  ;;  %v3166_v39 = vsub.s32 5, %v2719_v20  ;;  %v3175_v42 = vsub.s32 7, %v2719_v20  ;;  %v3178_v47 = vld [vmem:[%s3033_s9 + $0x38] sm:$0xff]  ;;  %v3182_v48 = vrot.slane %v3037_v61, %v3157_v28  ;;  %s2080_s9 = scalar_lea.sflag [#allocation3], %s3993_s29 }
 0x6a1   : > { %v1173_v57 = vmul.f32 %v3125_v38, %v1124_v52  ;;  %v1231_v58 = vmul.f32 %v3134_v44, %v1124_v52  ;;  %v1289_v59 = vmul.f32 %v3138_v45, %v1124_v52  ;;  %v1347_v2 = vmul.f32 %v3142_v46, %v1124_v52 }
 0x6a2   : > { %v1237_v10 = vadd.f32 %v1236_v54, %v1230_v49  ;;  %v1179_v17 = vadd.f32 %v1178_v53, %v1172_v43  ;;  %v1295_v19 = vadd.f32 %v1294_v55, %v1288_v50  ;;  %v1353_v25 = vadd.f32 %v1352_v56, %v1346_v51  ;;  %3970 = vst [vmem:[#allocation21_spill] sm:$0xff] %v3182_v48 }
 0x6a3   : > { %v3186_v7 = vrot.slane %v3037_v61, %v3160_v29  ;;  %v3191_v51 = vrot.slane %v3035_v60, %v3157_v28  ;;  %v3195_v20 = vrot.slane %v3035_v60, %v3160_v29  ;;  %v3199_v52 = vrot.slane %v3039_v62, %v3157_v28 }
 0x6a4   : > { %v1238_v31 = vadd.f32 %v1237_v10, %v1231_v58  ;;  %v1180_v32 = vadd.f32 %v1179_v17, %v1173_v57  ;;  %v1296_v35 = vadd.f32 %v1295_v19, %v1289_v59  ;;  %v1354_v36 = vadd.f32 %v1353_v25, %v1347_v2 }
 0x6a5   : > { %3971 = vst [vmem:[#allocation22_spill] sm:$0xff] %v3186_v7  ;;  %3972 = vst [vmem:[#allocation23_spill] sm:$0xff] %v3191_v51  ;;  %v3205_v56 = vrot.slane %v3037_v61, %v3166_v39  ;;  %v3209_v57 = vrot.slane %v3035_v60, %v3166_v39  ;;  %v3215_v2 = vrot.slane %v3037_v61, %v3175_v42 }
 0x6a6   : > { %3973 = vst [vmem:[#allocation24_spill] sm:$0xff] %v3195_v20  ;;  %3974 = vst [vmem:[#allocation25_spill] sm:$0xff] %v3199_v52  ;;  %v3219_v10 = vrot.slane %v3035_v60, %v3175_v42  ;;  %v3225_v25 = vrot.slane %v3039_v62, %v3166_v39  ;;  %v3236_v60 = vrot.slane %v3041_v63, %v3166_v39 }
 0x6a7   : > { %v1033_v43 = vpop.f32.mrb[8].mxu1  ;;  %3975 = vst [vmem:[#allocation26_spill] sm:$0xff] %v3205_v56  ;;  %3976 = vst [vmem:[#allocation27_spill] sm:$0xff] %v3209_v57  ;;  %v3247_v46 = vrot.slane %v3039_v62, %v3175_v42 }
 0x6a8   : > { %v1117_v4 = vmul.f32 %v1033_v43, %v3163_v37  ;;  %v1104_v49 = vpop.f32.mrb[6].mxu0  ;;  %v1035_v50 = vpop.f32.mrb[9].mxu1  ;;  %3977 = vst [vmem:[#allocation28_spill] sm:$0xff] %v3215_v2  ;;  %3978 = vst [vmem:[#allocation29_spill] sm:$0xff] %v3219_v10  ;;  %v3229_v43 = vrot.slane %v3041_v63, %v3157_v28 }
 0x6a9   : > { %v1119_v53 = vmul.f32 %v1104_v49, %v3169_v40  ;;  %v1118_v54 = vmul.f32 %v1035_v50, %v3172_v41  ;;  %v1106_v55 = vpop.f32.mrb[7].mxu0  ;;  %3979 = vst [vmem:[#allocation30_spill] sm:$0xff] %v3225_v25  ;;  %3981 = vst [vmem:[#allocation32_spill] sm:$0xff] %v3236_v60 }
 0x6aa   : > { %v1125_v58 = vmul.f32 %v1117_v4, %v3099_v27  ;;  %v1120_v59 = vmul.f32 %v1106_v55, %v3178_v47  ;;  %3980 = vst [vmem:[#allocation31_spill] sm:$0xff] %v3229_v43  ;;  %v3243_v55 = vrot.slane %v3039_v62, %v3160_v29  ;;  %3983 = vst [vmem:[#allocation34_spill] sm:$0xff] %v3247_v46 }
 0x6ab   : > { %v1127_v17 = vmul.f32 %v1119_v53, %v3099_v27  ;;  %v1126_v19 = vmul.f32 %v1118_v54, %v3099_v27 }
 0x6ac   : > { %v1232_v4 = vmul.f32 %v3182_v48, %v1125_v58  ;;  %v1174_v61 = vmul.f32 %v3191_v51, %v1125_v58  ;;  %v1290_v49 = vmul.f32 %v3199_v52, %v1125_v58  ;;  %v1128_v50 = vmul.f32 %v1120_v59, %v3099_v27  ;;  %3982 = vst [vmem:[#allocation33_spill] sm:$0xff] %v3243_v55 }
 0x6ad   : > { %v1233_v53 = vmul.f32 %v3205_v56, %v1126_v19  ;;  %v1175_v54 = vmul.f32 %v3209_v57, %v1126_v19  ;;  %v3251_v52 = vrot.slane %v3041_v63, %v3160_v29  ;;  %v1234_v27 = vmul.f32 %v3186_v7, %v1127_v17 }
 0x6ae   : > { %v1239_v18 = vadd.f32 %v1238_v31, %v1232_v4  ;;  %v1181_v12 = vadd.f32 %v1180_v32, %v1174_v61  ;;  %v1176_v59 = vmul.f32 %v3195_v20, %v1127_v17  ;;  %v1291_v24 = vmul.f32 %v3225_v25, %v1126_v19 }
 0x6af   : > { %3984 = vst [vmem:[#allocation35_spill] sm:$0xff] %v3251_v52  ;;  %v1297_v16 = vadd.f32 %v1296_v35, %v1290_v49  ;;  %v1348_v31 = vmul.f32 %v3229_v43, %v1125_v58  ;;  %v1349_v32 = vmul.f32 %v3236_v60, %v1126_v19  ;;  %v1235_v62 = vmul.f32 %v3215_v2, %v1128_v50 }
 0x6b0   : > { %v1240_v13 = vadd.f32 %v1239_v18, %v1233_v53  ;;  %v1182_v56 = vadd.f32 %v1181_v12, %v1175_v54  ;;  %v1292_v4 = vmul.f32 %v3243_v55, %v1127_v17  ;;  %v3262_v48 = vrot.slane %v3041_v63, %v3175_v42 }
 0x6b1   : > { %v1298_v61 = vadd.f32 %v1297_v16, %v1291_v24  ;;  %v1177_v20 = vmul.f32 %v3219_v10, %v1128_v50  ;;  %v1355_v35 = vadd.f32 %v1354_v36, %v1348_v31  ;;  %v1293_v12 = vmul.f32 %v3247_v46, %v1128_v50 }
 0x6b2   : > { %3985 = vst [vmem:[#allocation36_spill] sm:$0xff] %v3262_v48  ;;  %v1241_v7 = vadd.f32 %v1240_v13, %v1234_v27  ;;  %v1183_v25 = vadd.f32 %v1182_v56, %v1176_v59  ;;  %v1350_v19 = vmul.f32 %v3251_v52, %v1127_v17  ;;  %v1351_v24 = vmul.f32 %v3262_v48, %v1128_v50 }
 0x6b3   : > { %v1299_v18 = vadd.f32 %v1298_v61, %v1292_v4  ;;  %v1356_v53 = vadd.f32 %v1355_v35, %v1349_v32  ;;  %v3924_v13 = vmov 1   ;;  %v3923_v27 = vmov 2   ;;  %v307_v32 = vld [vmem:[%s3903_s2 + $0x82] sm:$0xf] }
 0x6b4   : > { %v1242_v58 = vadd.f32 %v1241_v7, %v1235_v62  ;;  %v1184_v49 = vadd.f32 %v1183_v25, %v1177_v20  ;;  %2480 = vset.pattern.permute.xlu1 %v3924_v13  ;;  %v3922_v59 = vmov 3   ;;  %v3986_v31 = vmov 0  }
 0x6b5   : > { %v1300_v54 = vadd.f32 %v1299_v18, %v1293_v12  ;;  %v1357_v63 = vadd.f32 %v1356_v53, %v1350_v19  ;;  %v1375_v4 = vrot.slane %v307_v32, %v2722_v22  ;;  %v3987_v61 = vlaneseq  ;;  %v2228_v12 = vld [vmem:[%s3903_s2 + $0x86] ss:$0 sm:$0xff] }
 0x6b6   : > { %1243 = vadd.xlane.f32.xlu0 %v1242_v58  ;;  %1185 = vadd.xlane.f32.xlu1 %v1184_v49  ;;  %v1389_v19 = vrot.slane %v307_v32, %v3050_v3 }
 0x6b7   : > { %v1358_v16 = vadd.f32 %v1357_v63, %v1351_v24  ;;  %v3338_v35 = vand.u32 127, %v3987_v61 }
 0x6b9   : > { %vm1563_vm11 = vcmp.lt.s32.totalorder %v3338_v35, 125  ;;  %vm1649_vm12 = vcmp.lt.s32.totalorder %v3338_v35, 126  ;;  %vm1735_vm13 = vcmp.lt.s32.totalorder %v3338_v35, 127 }
 0x6ba   : > { %1301 = vadd.xlane.f32.xlu0 %v1300_v54  ;;  %1359 = vadd.xlane.f32.xlu1 %v1358_v16  ;;  %v1399_v54 = vrot.slane %v307_v32, %v3044_v0 }
 0x6cb   : > { %1545 = vrot.lane.b32.xlu1 %v3047_v1, %s2572_s12 }
 0x743   : > { %v1244_v36 = vpop.xlane.xlu0 %1243  ;;  %v1186_v7 = vpop.xlane.xlu1 %1185 }
 0x744   : > { %v1362_v20 = vsel %vm1361_vm8, %v1186_v7, %v1244_v36 }
 0x747   : > { %v1302_v56 = vpop.xlane.xlu0 %1301  ;;  %v1360_v17 = vpop.xlane.xlu1 %1359 }
 0x748   : > { %v1364_v25 = vsel %vm1363_vm9, %v1362_v20, %v1302_v56  ;;  %v1409_v56 = vrot.slane %v307_v32, %v3079_v15  ;;  %v2233_v32 = vld [vmem:[%s3904_s3 + $0x200] ss:$8 sm:$0xf0] }
 0x749   : > { %v1366_v50 = vsel %vm1365_vm10, %v1364_v25, %v1360_v17  ;;  %v2230_v25 = vld [vmem:[%s3904_s3 + $0x203] ss:$8 sm:$0xf] }
 0x74a   : > { %1383 = vperm.xlu1 %2480, %v1366_v50   ;;  %1369 = vperm.xlu0 %2479, %v1366_v50  }
 0x74b   : > { %v1546_v62 = vpop.permute.xlu1 %1545 }
 0x74e   : > { %2481 = vset.pattern.permute.xlu1 %v3923_v27  ;;  %1547 = vrot.lane.b32.xlu0 %v3064_v9, %s2572_s12 }
 0x74f   : > { %1393 = vperm.xlu1 %2481, %v1366_v50   ;;  %2487 = vset.pattern.permute.xlu0 %v3922_v59 }
 0x752   : > { %1551 = vrot.lane.b32.xlu0 %v3095_v26, %s2572_s12 }
 0x753   : > { %2482 = vset.pattern.permute.xlu1 %v3922_v59 }
 0x754   : > { %1403 = vperm.xlu1 %2482, %v1366_v50   ;;  %v2231_v50 = vld [vmem:[%s3904_s3 + $0x203] ss:$8 sm:$0xf0] }
 0x756   : > { %1555 = vrot.lane.b32.xlu0 %v3172_v41, %s2572_s12 }
 0x758   : > { %1549 = vrot.lane.b32.xlu1 %v3061_v8, %s2572_s12 }
 0x759   : > { %2483 = vset.pattern.permute.xlu1 %v3986_v31 }
 0x75a   : > { %1559 = vrot.lane.b32.xlu0 %v3178_v47, %s2572_s12 }
 0x75c   : > { %1553 = vrot.lane.b32.xlu1 %v3163_v37, %s2572_s12 }
 0x75e   : > { %1635 = vrot.lane.b32.xlu0 %v3064_v9, %s2575_s11 }
 0x760   : > { %1557 = vrot.lane.b32.xlu1 %v3169_v40, %s2572_s12  ;;  %s2500_s12 = scalar_lea.vmem %s2099_s26, 128 }
 0x761   : > { %p2501_p11 = scmp.ne.s32.totalorder %s2099_s26, %s2500_s12 }
 0x762   : > { %1639 = vrot.lane.b32.xlu0 %v3095_v26, %s2575_s11 }
 0x763   : > { %p2502_p12 = pnand %p2501_p11, %p2654_p5 }
 0x764   : > { %1633 = vrot.lane.b32.xlu1 %v3047_v1, %s2575_s11 }
 0x765   : > { %p2503_p13 = pneg %p2502_p12 }
 0x766   : > { %1643 = vrot.lane.b32.xlu0 %v3172_v41, %s2575_s11 }
 0x768   : > { %1637 = vrot.lane.b32.xlu1 %v3061_v8, %s2575_s11 }
 0x76a   : > { %1647 = vrot.lane.b32.xlu0 %v3178_v47, %s2575_s11 }
 0x76c   : > { %1641 = vrot.lane.b32.xlu1 %v3163_v37, %s2575_s11 }
 0x76e   : > { %1721 = vrot.lane.b32.xlu0 %v3064_v9, %s2576_s10 }
 0x770   : > { %1645 = vrot.lane.b32.xlu1 %v3169_v40, %s2575_s11  ;;  %s2580_s11 = smov [#allocation2]  }
 0x772   : > { %1725 = vrot.lane.b32.xlu0 %v3095_v26, %s2576_s10 }
 0x774   : > { %1719 = vrot.lane.b32.xlu1 %v3047_v1, %s2576_s10 }
 0x776   : > { %1729 = vrot.lane.b32.xlu0 %v3172_v41, %s2576_s10 }
 0x778   : > { %1723 = vrot.lane.b32.xlu1 %v3061_v8, %s2576_s10 }
 0x77a   : > { %1733 = vrot.lane.b32.xlu0 %v3178_v47, %s2576_s10 }
 0x77c   : > { %1727 = vrot.lane.b32.xlu1 %v3163_v37, %s2576_s10 }
 0x77e   : > { %1807 = vrot.lane.b32.xlu0 %v3064_v9, %s2577_s28 }
 0x780   : > { %1731 = vrot.lane.b32.xlu1 %v3169_v40, %s2576_s10  ;;  %s2504_s10 = sshll.u32 %s2580_s11, 4  ;;  %s2505_s10 = int_to_ptr.vmem [resolvable:$false] %s2504_s10 }
 0x781   : > { %p2507_p0 = scmp.lt.s32.totalorder %s2099_s26, %s2505_s10 }
 0x782   : > { %1811 = vrot.lane.b32.xlu0 %v3095_v26, %s2577_s28 }
 0x784   : > { %1805 = vrot.lane.b32.xlu1 %v3047_v1, %s2577_s28 }
 0x786   : > { %1815 = vrot.lane.b32.xlu0 %v3172_v41, %s2577_s28 }
 0x788   : > { %1809 = vrot.lane.b32.xlu1 %v3061_v8, %s2577_s28 }
 0x78a   : > { %1819 = vrot.lane.b32.xlu0 %v3178_v47, %s2577_s28 }
 0x78c   : > { %1813 = vrot.lane.b32.xlu1 %v3163_v37, %s2577_s28 }
 0x78e   : > { %1893 = vrot.lane.b32.xlu0 %v3064_v9, %s2578_s14 }
 0x790   : > { %1817 = vrot.lane.b32.xlu1 %v3169_v40, %s2577_s28  ;;  %s2245_s28 = sshll.u32 %s2637_s25, 7 }
 0x791   : > { %s3516_s18 = scalar_lea.hbm %s3906_s5, %s2245_s28 }
 0x792   : > { %1897 = vrot.lane.b32.xlu0 %v3095_v26, %s2578_s14 }
 0x794   : > { %1891 = vrot.lane.b32.xlu1 %v3047_v1, %s2578_s14 }
 0x796   : > { %1901 = vrot.lane.b32.xlu0 %v3172_v41, %s2578_s14 }
 0x798   : > { %1895 = vrot.lane.b32.xlu1 %v3061_v8, %s2578_s14 }
 0x79a   : > { %1905 = vrot.lane.b32.xlu0 %v3178_v47, %s2578_s14 }
 0x79c   : > { %1899 = vrot.lane.b32.xlu1 %v3163_v37, %s2578_s14 }
 0x79e   : > { %1979 = vrot.lane.b32.xlu0 %v3064_v9, %s2579_s16 }
 0x7a0   : > { %1903 = vrot.lane.b32.xlu1 %v3169_v40, %s2578_s14 }
 0x7a2   : > { %1983 = vrot.lane.b32.xlu0 %v3095_v26, %s2579_s16 }
 0x7a4   : > { %1977 = vrot.lane.b32.xlu1 %v3047_v1, %s2579_s16 }
 0x7a6   : > { %1987 = vrot.lane.b32.xlu0 %v3172_v41, %s2579_s16 }
 0x7a8   : > { %1981 = vrot.lane.b32.xlu1 %v3061_v8, %s2579_s16 }
 0x7aa   : > { %1991 = vrot.lane.b32.xlu0 %v3178_v47, %s2579_s16 }
 0x7c9   : > { %v1370_v18 = vpop.permute.xlu0 %1369  ;;  %v1384_v58 = vpop.permute.xlu1 %1383 }
 0x7ca   : > { %v1376_v49 = vmul.f32 %v1375_v4, %v1370_v18  ;;  %v1390_v63 = vmul.f32 %v1389_v19, %v1384_v58  ;;  %v2232_v58 = vld [vmem:[%s3904_s3 + $0x200] ss:$8 sm:$0xf] }
 0x7cc   : > { %v1381_v53 = vadd.f32 %v2228_v12, %v1376_v49  ;;  %v3355_v12 = vor.u32 %v2231_v50, %v2230_v25  ;;  %v2235_v25 = vld [vmem:[%s3904_s3 + $0x201] ss:$8 sm:$0xf0] }
 0x7cd   : > { %v1548_v24 = vpop.permute.xlu0 %1547 }
 0x7ce   : > { %v1570_v16 = vsel %vm1563_vm11, %v1546_v62, %v1548_v24  ;;  %v1394_v36 = vpop.permute.xlu1 %1393  ;;  %v1391_v7 = vadd.f32 %v1390_v63, %v1381_v53  ;;  %v1528_v50 = vrot.slane %v3355_v12, %v3175_v42  ;;  %v1504_v59 = vrot.slane %v3355_v12, %v3050_v3 }
 0x7cf   : > { %v1400_v20 = vmul.f32 %v1399_v54, %v1394_v36  ;;  %v1500_v36 = vrot.slane %v3355_v12, %v2722_v22 }
 0x7d0   : > { %v1544_v27 = vmul.f32 %v1528_v50, %v3178_v47 }
 0x7d1   : > { %v1552_v17 = vpop.permute.xlu0 %1551  ;;  %v1401_v4 = vadd.f32 %v1400_v20, %v1391_v7  ;;  %v3372_v7 = vor.u32 %v2233_v32, %v2232_v58  ;;  %v1537_v32 = vmul.f32 %v1500_v36, %v3047_v1  ;;  %v1512_v36 = vrot.slane %v3355_v12, %v3079_v15 }
 0x7d3   : > { %v1404_v31 = vpop.permute.xlu1 %1403  ;;  %v1608_v13 = vrot.slane %v3372_v7, %v3175_v42  ;;  %v1588_v1 = vrot.slane %v3372_v7, %v3044_v0  ;;  %v1592_v52 = vrot.slane %v3372_v7, %v3079_v15  ;;  %v1596_v46 = vrot.slane %v3372_v7, %v3157_v28 }
 0x7d4   : > { %v1410_v61 = vmul.f32 %v1409_v56, %v1404_v31  ;;  %v2234_v56 = vld [vmem:[%s3904_s3 + $0x201] ss:$8 sm:$0xf]  ;;  %v1540_v2 = vmul.f32 %v1512_v36, %v3095_v26  ;;  %v1600_v45 = vrot.slane %v3372_v7, %v3166_v39 }
 0x7d5   : > { %v1556_v18 = vpop.permute.xlu0 %1555  ;;  %v3388_v58 = vor.u32 %v2235_v25, %v2234_v56  ;;  %v1516_v56 = vrot.slane %v3355_v12, %v3157_v28 }
 0x7d6   : > { %v3363_v49 = vadd.f32 %v1410_v61, %v1401_v4 }
 0x7d7   : > { %v1550_v19 = vpop.permute.xlu1 %1549  ;;  %v1666_v50 = vrot.slane %v3388_v58, %v2722_v22  ;;  %v1694_v60 = vrot.slane %v3388_v58, %v3175_v42  ;;  %v1541_v10 = vmul.f32 %v1516_v56, %v3163_v37  ;;  %v1604_v56 = vrot.slane %v3372_v7, %v3160_v29 }
 0x7d8   : > { %v2229_v53 = vmul.f32 -1.442695, %v3363_v49  ;;  %v1568_v54 = vsel %vm1563_vm11, %v1550_v19, %v1552_v17  ;;  %v1569_v63 = vsel %vm1563_vm11, %v1548_v24, %v1550_v19  ;;  %v1580_v19 = vrot.slane %v3372_v7, %v2722_v22 }
 0x7d9   : > { %v1560_v20 = vpop.permute.xlu0 %1559  ;;  %v1619_v43 = vmul.f32 %v1588_v1, %v1568_v54 }
 0x7da   : > { %2496 = vpow2.f32 %v2229_v53  ;;  %v1571_v24 = vsel %vm1563_vm11, %v1560_v20, %v1546_v62  ;;  %v1508_v62 = vrot.slane %v3355_v12, %v3044_v0  ;;  %v1617_v48 = vmul.f32 %v1580_v19, %v1570_v16 }
 0x7db   : > { %v1554_v31 = vpop.permute.xlu1 %1553  ;;  %v1524_v16 = vrot.slane %v3355_v12, %v3160_v29 }
 0x7dc   : > { %v1566_v4 = vsel %vm1563_vm11, %v1554_v31, %v1556_v18  ;;  %v1567_v61 = vsel %vm1563_vm11, %v1552_v17, %v1554_v31  ;;  %v1584_v17 = vrot.slane %v3372_v7, %v3050_v3 }
 0x7dd   : > { %v1636_v53 = vpop.permute.xlu0 %1635  ;;  %v1621_v1 = vmul.f32 %v1596_v46, %v1566_v4  ;;  %v1543_v14 = vmul.f32 %v1524_v16, %v3169_v40  ;;  %v1678_v46 = vrot.slane %v3388_v58, %v3079_v15 }
 0x7de   : > { %v1618_v19 = vmul.f32 %v1584_v17, %v1569_v63  ;;  %v1624_v63 = vmul.f32 %v1608_v13, %v1571_v24  ;;  %v1620_v17 = vmul.f32 %v1592_v52, %v1567_v61 }
 0x7df   : > { %v1558_v25 = vpop.permute.xlu1 %1557  ;;  %v1629_v4 = vadd.f32 %v1621_v1, %v1541_v10 }
 0x7e0   : > { %v1564_v31 = vsel %vm1563_vm11, %v1558_v25, %v1560_v20  ;;  %v1565_v47 = vsel %vm1563_vm11, %v1556_v18, %v1558_v25  ;;  %v1538_v20 = vmul.f32 %v1504_v59, %v3064_v9  ;;  %v1539_v18 = vmul.f32 %v1508_v62, %v3061_v8 }
 0x7e1   : > { %v1640_v55 = vpop.permute.xlu0 %1639  ;;  %v1520_v25 = vrot.slane %v3355_v12, %v3166_v39  ;;  %v1670_v9 = vrot.slane %v3388_v58, %v3050_v3  ;;  %v1674_v59 = vrot.slane %v3388_v58, %v3044_v0  ;;  %v1625_v12 = vadd.f32 %v1617_v48, %v1537_v32 }
 0x7e2   : > { %v1626_v23 = vadd.f32 %v1618_v19, %v1538_v20  ;;  %v1627_v34 = vadd.f32 %v1619_v43, %v1539_v18  ;;  %v1682_v43 = vrot.slane %v3388_v58, %v3157_v28  ;;  %v1628_v24 = vadd.f32 %v1620_v17, %v1540_v2 }
 0x7e3   : > { %v1634_v57 = vpop.permute.xlu1 %1633  ;;  %v1542_v36 = vmul.f32 %v1520_v25, %v3172_v41  ;;  %v1632_v41 = vadd.f32 %v1624_v63, %v1544_v27  ;;  %v1622_v61 = vmul.f32 %v1600_v45, %v1565_v47  ;;  %v1686_v2 = vrot.slane %v3388_v58, %v3166_v39  ;;  %v2237_v63 = vld [vmem:[%s3904_s3 + $0x202] ss:$8 sm:$0xf0] }
 0x7e4   : > { %v2497_v51 = vpop.eup %2496  ;;  %v1656_v8 = vsel %vm1649_vm12, %v1634_v57, %v1636_v53 }
 0x7e5   : > { %v1415_v54 = vadd.f32 1.0, %v2497_v51  ;;  %v1703_v26 = vmul.f32 %v1666_v50, %v1656_v8  ;;  %v1644_v62 = vpop.permute.xlu0 %1643  ;;  %v1623_v50 = vmul.f32 %v1604_v56, %v1564_v31 }
 0x7e7   : > { %2498 = vrcp.f32 %v1415_v54  ;;  %v3440_v11 = vadd.f32 %v1703_v26, %v1625_v12  ;;  %v1638_v38 = vpop.permute.xlu1 %1637 }
 0x7e8   : > { %v1654_v48 = vsel %vm1649_vm12, %v1638_v38, %v1640_v55  ;;  %v1655_v51 = vsel %vm1649_vm12, %v1636_v53, %v1638_v38 }
 0x7e9   : > { %v1704_v52 = vmul.f32 %v1670_v9, %v1655_v51  ;;  %v1705_v13 = vmul.f32 %v1674_v59, %v1654_v48  ;;  %v1648_v7 = vpop.permute.xlu0 %1647 }
 0x7ea   : > { %v1657_v32 = vsel %vm1649_vm12, %v1648_v7, %v1634_v57 }
 0x7eb   : > { %v3453_v20 = vadd.f32 %v1704_v52, %v1626_v23  ;;  %v3455_v38 = vadd.f32 %v1705_v13, %v1627_v34  ;;  %v1710_v53 = vmul.f32 %v1694_v60, %v1657_v32  ;;  %v1642_v18 = vpop.permute.xlu1 %1641  ;;  %v1690_v23 = vrot.slane %v3388_v58, %v3160_v29 }
 0x7ec   : > { %v1652_v27 = vsel %vm1649_vm12, %v1642_v18, %v1644_v62  ;;  %v1653_v25 = vsel %vm1649_vm12, %v1640_v55, %v1642_v18  ;;  %v1630_v34 = vadd.f32 %v1622_v61, %v1542_v36  ;;  %v1631_v60 = vadd.f32 %v1623_v50, %v1543_v14  ;;  %v2236_v14 = vld [vmem:[%s3904_s3 + $0x202] ss:$8 sm:$0xf] }
 0x7ed   : > { %v1718_v45 = vadd.f32 %v1710_v53, %v1632_v41  ;;  %v1706_v10 = vmul.f32 %v1678_v46, %v1653_v25  ;;  %v1707_v47 = vmul.f32 %v1682_v43, %v1652_v27  ;;  %v3463_v57 = vpop.permute.xlu0 %1721  ;;  %v3988_v36 = vmov 1  }
 0x7ee   : > { %v3990_v52 = vmov 2   ;;  %v3991_v13 = vmov 3  }
 0x7ef   : > { %v3467_v31 = vadd.f32 %v1706_v10, %v1628_v24  ;;  %v3469_v16 = vadd.f32 %v1707_v47, %v1629_v4  ;;  %v1646_v19 = vpop.permute.xlu1 %1645 }
 0x7f0   : > { %v1650_v55 = vsel %vm1649_vm12, %v1646_v19, %v1648_v7  ;;  %v1651_v8 = vsel %vm1649_vm12, %v1644_v62, %v1646_v19  ;;  %v3488_v62 = vor.u32 %v2237_v63, %v2236_v14 }
 0x7f1   : > { %v2499_v9 = vpop.eup %2498  ;;  %v1708_v59 = vmul.f32 %v1686_v2, %v1651_v8  ;;  %v1709_v12 = vmul.f32 %v1690_v23, %v1650_v55  ;;  %v3475_v54 = vpop.permute.xlu0 %1725 }
 0x7f2   : > { %v1418_v58 = vmul.f32 %v2499_v9, %v3363_v49  ;;  %v1780_v49 = vrot.slane %v3488_v62, %v3175_v42 }
 0x7f3   : > { %v3484_v26 = vadd.f32 %v1708_v59, %v1630_v34  ;;  %v3486_v17 = vadd.f32 %v1709_v12, %v1631_v60  ;;  %v3496_v56 = vpop.permute.xlu1 %1719 }
 0x7f4   : > { %1421 = vperm.xlu1 %2483, %v1418_v58  }
 0x7f5   : > { %v3490_v1 = vpop.permute.xlu0 %1729 }
 0x7f8   : > { %2484 = vset.pattern.permute.xlu1 %v3988_v36 }
 0x7f9   : > { %v3498_v48 = vpop.permute.xlu0 %1733  ;;  %1433 = vperm.xlu1 %2484, %v1418_v58  }
 0x7fa   : > { %v1743_v51 = vsel %vm1735_vm13, %v3498_v48, %v3496_v56 }
 0x7fb   : > { %v1796_v46 = vmul.f32 %v1780_v49, %v1743_v51 }
 0x7fd   : > { %v3504_v41 = vadd.f32 %v1796_v46, %v1718_v45  ;;  %2485 = vset.pattern.permute.xlu1 %v3990_v52 }
 0x7fe   : > { %1453 = vperm.xlu1 %2485, %v1418_v58  }
 0x7ff   : > { %3989 = vst [vmem:[#allocation37_spill] sm:$0xff] %v3504_v41 }
 0x802   : > { %2486 = vset.pattern.permute.xlu1 %v3991_v13 }
 0x803   : > { %1473 = vperm.xlu1 %2486, %v1418_v58  }
 0x807   : > { %1985 = vrot.lane.b32.xlu1 %v3163_v37, %s2579_s16 }
 0x80b   : > { %1989 = vrot.lane.b32.xlu1 %v3169_v40, %s2579_s16  ;;  %s2506_s16 = scalar_lea.vmem %s2505_s10, 256 }
 0x80c   : > { %p2508_p1 = scmp.lt.s32.totalorder %s2506_s16, %s2500_s12 }
 0x80e   : > { %p2509_p2 = por %p2508_p1, %p2507_p0 }
 0x810   : > { %p2510_p3 = pnand %p2509_p2, %p2503_p13 }
 0x812   : > { %2513 = shalt.err (!%p2510_p3)
}
 0x813   : > { %s2514_s25 = scalar_lea.hbm %s3516_s18, 128  ;;  %s2518_s14 = scalar_lea.hbm %s3906_s5, 512 }
 0x814   : > { %p2515_p4 = scmp.ne.s32.totalorder %s3516_s18, %s2514_s25  ;;  %p2519_p9 = scmp.lt.u32.totalorder %s3516_s18, %s3906_s5 }
 0x815   : > { %p2520_p10 = scmp.lt.u32.totalorder %s2518_s14, %s2514_s25  ;;  %p2522_p12 = scmp.lt.u32.totalorder %s2514_s25, %s3516_s18 }
 0x816   : > { %p2516_p7 = pnand %p2515_p4, %p2654_p5 }
 0x817   : > { %p2521_p11 = por %p2520_p10, %p2519_p9 }
 0x818   : > { %p2517_p8 = pneg %p2516_p7 }
 0x819   : > { %p2523_p13 = por %p2522_p12, %p2521_p11 }
 0x81b   : > { %p2524_p0 = pnand %p2523_p13, %p2517_p8 }
 0x81d   : > { %2527 = shalt.err (!%p2524_p0)
}
 0x81e   : > { %2424 = dma.vmem_to_hbm [thread:$0]  (%p2654_p5), %s2099_s26, 128, %s3516_s18, %s2080_s9   ;;  %v1724_v37 = vpop.permute.xlu1 %1723  ;;  %v3539_v7 = vpop.permute.xlu0 %1807  ;;  %v2238_v23 = vld [vmem:[%s3904_s3 + $0x204] ss:$8 sm:$0xf]  ;;  %v1752_v9 = vrot.slane %v3488_v62, %v2722_v22  ;;  %v1756_v59 = vrot.slane %v3488_v62, %v3050_v3  ;;  %v1760_v12 = vrot.slane %v3488_v62, %v3044_v0  ;;  %v1764_v63 = vrot.slane %v3488_v62, %v3079_v15 }
 0x81f   : > { %v2239_v34 = vld [vmem:[%s3904_s3 + $0x204] ss:$8 sm:$0xf0]  ;;  %v2240_v60 = vld [vmem:[%s3904_s3 + $0x205] ss:$8 sm:$0xf]  ;;  %v1768_v49 = vrot.slane %v3488_v62, %v3157_v28  ;;  %v1772_v36 = vrot.slane %v3488_v62, %v3166_v39  ;;  %v1776_v51 = vrot.slane %v3488_v62, %v3160_v29  ;;  %v1740_v33 = vsel %vm1735_vm13, %v1724_v37, %v3475_v54  ;;  %s3840_s19 = scalar_lea.vmem %s3907_s6, %s2248_s15 }
 0x820   : > { %v2241_v19 = vld [vmem:[%s3904_s3 + $0x205] ss:$8 sm:$0xf0]  ;;  %v3581_v8 = vor.u32 %v2239_v34, %v2238_v23  ;;  %vm1821_vm14 = vcmp.lt.s32.totalorder %v3338_v35, 1  ;;  %v1742_v44 = vsel %vm1735_vm13, %v3496_v56, %v3463_v57  ;;  %v1791_v41 = vmul.f32 %v1760_v12, %v1740_v33 }
 0x821   : > { %v3589_v58 = vor.u32 %v2241_v19, %v2240_v60  ;;  %v1741_v19 = vsel %vm1735_vm13, %v3463_v57, %v1724_v37  ;;  %v2243_v57 = vld [vmem:[%s3904_s3 + $0x206] ss:$8 sm:$0xf0]  ;;  %vm1907_vm15 = vcmp.lt.s32.totalorder %v3338_v35, 2  ;;  %vm1993_vm0 = vcmp.lt.s32.totalorder %v3338_v35, 3 }
 0x822   : > { %v1728_v40 = vpop.permute.xlu1 %1727  ;;  %v3541_v24 = vpop.permute.xlu0 %1811  ;;  %v1842_v46 = vrot.slane %v3581_v8, %v3050_v3  ;;  %v1846_v52 = vrot.slane %v3581_v8, %v3044_v0  ;;  %v1850_v13 = vrot.slane %v3581_v8, %v3079_v15  ;;  %v1838_v23 = vrot.slane %v3581_v8, %v2722_v22 }
 0x823   : > { %v1854_v34 = vrot.slane %v3581_v8, %v3157_v28  ;;  %v1858_v62 = vrot.slane %v3581_v8, %v3166_v39  ;;  %v1862_v60 = vrot.slane %v3581_v8, %v3160_v29  ;;  %v1738_v6 = vsel %vm1735_vm13, %v1728_v40, %v3490_v1 }
 0x824   : > { %v1739_v30 = vsel %vm1735_vm13, %v3475_v54, %v1728_v40  ;;  %v2242_v54 = vld [vmem:[%s3904_s3 + $0x206] ss:$8 sm:$0xf]  ;;  %v1790_v56 = vmul.f32 %v1756_v59, %v1741_v19  ;;  %v1944_v40 = vrot.slane %v3589_v58, %v3166_v39 }
 0x825   : > { %v1792_v5 = vmul.f32 %v1764_v63, %v1739_v30 }
 0x826   : > { %v1732_v43 = vpop.permute.xlu1 %1731  ;;  %v3545_v61 = vpop.permute.xlu0 %1815 }
 0x827   : > { %v1737_v37 = vsel %vm1735_vm13, %v3490_v1, %v1732_v43  ;;  %v1736_v1 = vsel %vm1735_vm13, %v1732_v43, %v3498_v48  ;;  %v3671_v43 = vor.u32 %v2243_v57, %v2242_v54 }
 0x828   : > { %v1794_v59 = vmul.f32 %v1772_v36, %v1737_v37  ;;  %v1795_v19 = vmul.f32 %v1776_v51, %v1736_v1 }
 0x82a   : > { %v3543_v4 = vpop.permute.xlu1 %1805  ;;  %v3549_v50 = vpop.permute.xlu0 %1819  ;;  %v1802_v51 = vadd.f32 %v1794_v59, %v3484_v26 }
 0x82b   : > { %v1828_v48 = vsel %vm1821_vm14, %v3543_v4, %v3539_v7  ;;  %v1829_v33 = vsel %vm1821_vm14, %v3549_v50, %v3543_v4  ;;  %v1799_v4 = vadd.f32 %v1791_v41, %v3455_v38 }
 0x82c   : > { %v1875_v57 = vmul.f32 %v1838_v23, %v1829_v33 }
 0x82e   : > { %v3547_v32 = vpop.permute.xlu1 %1809  ;;  %v3553_v18 = vpop.permute.xlu0 %1893 }
 0x82f   : > { %v1827_v30 = vsel %vm1821_vm14, %v3539_v7, %v3547_v32 }
 0x830   : > { %v1877_v37 = vmul.f32 %v1846_v52, %v1827_v30  ;;  %v3999_v52 = vrot.slane %v3581_v8, %v3175_v42 }
 0x832   : > { %v3551_v53 = vpop.permute.xlu1 %1813  ;;  %v3557_v25 = vpop.permute.xlu0 %1897 }
 0x833   : > { %v1824_v12 = vsel %vm1821_vm14, %v3551_v53, %v3545_v61  ;;  %v1825_v63 = vsel %vm1821_vm14, %v3541_v24, %v3551_v53 }
 0x834   : > { %v1879_v53 = vmul.f32 %v1854_v34, %v1825_v63 }
 0x836   : > { %v3555_v27 = vpop.permute.xlu1 %1817  ;;  %v3561_v45 = vpop.permute.xlu0 %1901 }
 0x837   : > { %3994 = vst [vmem:[#allocation38_spill] sm:$0xff] %v3561_v45  ;;  %v1789_v45 = vmul.f32 %v1752_v9, %v1742_v44  ;;  %v1798_v9 = vadd.f32 %v1790_v56, %v3453_v20  ;;  %v1823_v7 = vsel %vm1821_vm14, %v3545_v61, %v3555_v27  ;;  %v1880_v56 = vmul.f32 %v1858_v62, %v1824_v12 }
 0x838   : > { %v1881_v1 = vmul.f32 %v1862_v60, %v1823_v7 }
 0x839   : > { %v1797_v61 = vadd.f32 %v1789_v45, %v3440_v11  ;;  %v2010_v11 = vrot.slane %v3671_v43, %v2722_v22 }
 0x83a   : > { %v3559_v2 = vpop.permute.xlu1 %1891  ;;  %v3565_v47 = vpop.permute.xlu0 %1905 }
 0x83b   : > { %v1883_v45 = vadd.f32 %v1875_v57, %v1797_v61  ;;  %v1914_v62 = vsel %vm1907_vm15, %v3559_v2, %v3553_v18  ;;  %v1915_v8 = vsel %vm1907_vm15, %v3565_v47, %v3559_v2  ;;  %v4010_v61 = vld [vmem:[#allocation37_spill] sm:$0xff] }
 0x83e   : > { %v3563_v10 = vpop.permute.xlu1 %1895  ;;  %v3591_v14 = vpop.permute.xlu0 %1979 }
 0x83f   : > { %3996 = vst [vmem:[#allocation40_spill] sm:$0xff] %v3591_v14  ;;  %v1948_v14 = vrot.slane %v3589_v58, %v3160_v29  ;;  %v1912_v60 = vsel %vm1907_vm15, %v3563_v10, %v3557_v25  ;;  %v1913_v59 = vsel %vm1907_vm15, %v3553_v18, %v3563_v10 }
 0x842   : > { %v3579_v55 = vpop.permute.xlu1 %1899 }
 0x843   : > { %3995 = vst [vmem:[#allocation39_spill] sm:$0xff] %v3579_v55  ;;  %v1952_v55 = vrot.slane %v3589_v58, %v3175_v42 }
 0x846   : > { %v3625_v21 = vpop.permute.xlu1 %1903 }
 0x847   : > { %3997 = vst [vmem:[#allocation41_spill] sm:$0xff] %v3625_v21  ;;  %v3649_v21 = vpop.permute.xlu0 %1983 }
 0x848   : > { %3998 = vst [vmem:[#allocation42_spill] sm:$0xff] %v3649_v21  ;;  %v1793_v21 = vmul.f32 %v1768_v49, %v1738_v6  ;;  %v1826_v6 = vsel %vm1821_vm14, %v3547_v32, %v3541_v24  ;;  %v1800_v32 = vadd.f32 %v1792_v5, %v3467_v31  ;;  %v1876_v49 = vmul.f32 %v1842_v46, %v1828_v48  ;;  %v4000_v48 = vld [vmem:[#allocation38_spill] sm:$0xff] }
 0x849   : > { %v1878_v54 = vmul.f32 %v1850_v13, %v1826_v6  ;;  %v1803_v24 = vadd.f32 %v1795_v19, %v3486_v17  ;;  %v1822_v5 = vsel %vm1821_vm14, %v3555_v27, %v3549_v50  ;;  %v2018_v31 = vrot.slane %v3671_v43, %v3044_v0 }
 0x84a   : > { %v1978_v44 = vpop.permute.xlu1 %1977  ;;  %v1801_v20 = vadd.f32 %v1793_v21, %v3469_v16  ;;  %v2014_v21 = vrot.slane %v3671_v43, %v3050_v3  ;;  %v1884_v38 = vadd.f32 %v1876_v49, %v1798_v9  ;;  %v2022_v16 = vrot.slane %v3671_v43, %v3079_v15  ;;  %v4001_v19 = vld [vmem:[#allocation39_spill] sm:$0xff]  ;;  %v4003_v9 = vld [vmem:[#allocation40_spill] sm:$0xff] }
 0x84b   : > { %v3701_v36 = vpop.permute.xlu0 %1987  ;;  %v1885_v17 = vadd.f32 %v1877_v37, %v1799_v4  ;;  %v1886_v41 = vadd.f32 %v1878_v54, %v1800_v32  ;;  %v2026_v50 = vrot.slane %v3671_v43, %v3157_v28  ;;  %v1888_v46 = vadd.f32 %v1880_v56, %v1802_v51 }
 0x84c   : > { %v1887_v27 = vadd.f32 %v1879_v53, %v1801_v20  ;;  %v1882_v13 = vmul.f32 %v3999_v52, %v1822_v5  ;;  %v1889_v23 = vadd.f32 %v1881_v1, %v1803_v24  ;;  %v1910_v6 = vsel %vm1907_vm15, %v4001_v19, %v4000_v48 }
 0x84d   : > { %v1911_v30 = vsel %vm1907_vm15, %v3557_v25, %v4001_v19  ;;  %v2000_v12 = vsel %vm1993_vm0, %v1978_v44, %v4003_v9  ;;  %v4005_v4 = vrot.slane %v3589_v58, %v3050_v3  ;;  %v4006_v20 = vrot.slane %v3589_v58, %v3044_v0  ;;  %v4011_v19 = vld [vmem:[#allocation6_spill] sm:$0xff] }
 0x84e   : > { %v1982_v26 = vpop.permute.xlu1 %1981  ;;  %v4002_v33 = vld [vmem:[#allocation41_spill] sm:$0xff]  ;;  %v4007_v51 = vrot.slane %v3589_v58, %v3079_v15  ;;  %v4008_v54 = vrot.slane %v3589_v58, %v2722_v22  ;;  %v4009_v24 = vrot.slane %v3589_v58, %v3157_v28  ;;  %v1966_v3 = vmul.f32 %v1944_v40, %v1910_v6 }
 0x84f   : > { %v3724_v34 = vpop.permute.xlu0 %1991  ;;  %v1908_v18 = vsel %vm1907_vm15, %v4002_v33, %v3565_v47  ;;  %v1909_v2 = vsel %vm1907_vm15, %v4000_v48, %v4002_v33  ;;  %v4004_v63 = vld [vmem:[#allocation42_spill] sm:$0xff]  ;;  %v1999_v25 = vsel %vm1993_vm0, %v4003_v9, %v1982_v26  ;;  %v1962_v32 = vmul.f32 %v4005_v4, %v1914_v62 }
 0x850   : > { %v1998_v7 = vsel %vm1993_vm0, %v1982_v26, %v4004_v63  ;;  %v2001_v47 = vsel %vm1993_vm0, %v3724_v34, %v1978_v44  ;;  %v1963_v49 = vmul.f32 %v4006_v20, %v1913_v59  ;;  %v1964_v37 = vmul.f32 %v4007_v51, %v1912_v60 }
 0x851   : > { %v1961_v57 = vmul.f32 %v4008_v54, %v1915_v8  ;;  %v1965_v44 = vmul.f32 %v4009_v24, %v1911_v30  ;;  %v1967_v0 = vmul.f32 %v1948_v14, %v1909_v2  ;;  %v1968_v15 = vmul.f32 %v1952_v55, %v1908_v18  ;;  %v4012_v30 = vld [vmem:[#allocation14_spill] sm:$0xff] }
 0x852   : > { %v2048_v53 = vmul.f32 %v2014_v21, %v2000_v12  ;;  %v2049_v56 = vmul.f32 %v2018_v31, %v1999_v25  ;;  %v2050_v22 = vmul.f32 %v2022_v16, %v1998_v7  ;;  %v2047_v1 = vmul.f32 %v2010_v11, %v2001_v47  ;;  %v4018_v12 = vld [vmem:[#allocation17_spill] sm:$0xff]  ;;  %v4019_v47 = vld [vmem:[#allocation7_spill] sm:$0xff] }
 0x853   : > { %v1890_v5 = vadd.f32 %v1882_v13, %v4010_v61  ;;  %v2030_v52 = vrot.slane %v3671_v43, %v3166_v39  ;;  %v2034_v40 = vrot.slane %v3671_v43, %v3160_v29  ;;  %v2038_v14 = vrot.slane %v3671_v43, %v3175_v42 }
 0x854   : > { %v1970_v62 = vadd.f32 %v1962_v32, %v1884_v38  ;;  %v1971_v60 = vadd.f32 %v1963_v49, %v1885_v17  ;;  %v1972_v58 = vadd.f32 %v1964_v37, %v1886_v41  ;;  %v1969_v55 = vadd.f32 %v1961_v57, %v1883_v45  ;;  %v4013_v38 = vld [vmem:[#allocation10_spill] sm:$0xff]  ;;  %v4020_v32 = vld [vmem:[#allocation15_spill] sm:$0xff] }
 0x855   : > { %v3801_v21 = vadd.f32 %v1965_v44, %v1887_v27  ;;  %v3803_v31 = vadd.f32 %v1966_v3, %v1888_v46  ;;  %v3805_v16 = vadd.f32 %v1967_v0, %v1889_v23  ;;  %v3807_v11 = vadd.f32 %v1968_v15, %v1890_v5  ;;  %v4014_v41 = vld [vmem:[#allocation18_spill] sm:$0xff]  ;;  %v4015_v27 = vld [vmem:[#allocation5_spill] sm:$0xff]  ;;  %v4021_v49 = vld [vmem:[#allocation11_spill] sm:$0xff] }
 0x856   : > { %v2056_v13 = vadd.f32 %v2048_v53, %v1970_v62  ;;  %v2057_v59 = vadd.f32 %v2049_v56, %v1971_v60  ;;  %v2058_v8 = vadd.f32 %v2050_v22, %v1972_v58  ;;  %v2055_v48 = vadd.f32 %v2047_v1, %v1969_v55  ;;  %v4016_v46 = vld [vmem:[#allocation13_spill] sm:$0xff]  ;;  %v4022_v37 = vld [vmem:[#allocation19_spill] sm:$0xff]  ;;  %v4026_v53 = vld [vmem:[#allocation26_spill] sm:$0xff] }
 0x857   : > { %v4017_v23 = vld [vmem:[#allocation9_spill] sm:$0xff]  ;;  %v4023_v57 = vld [vmem:[#allocation23_spill] sm:$0xff]  ;;  %v4027_v62 = vld [vmem:[#allocation24_spill] sm:$0xff] }
 0x858   : > { %v4024_v44 = vld [vmem:[#allocation27_spill] sm:$0xff]  ;;  %v4025_v0 = vld [vmem:[#allocation21_spill] sm:$0xff] }
 0x859   : > { %v4028_v58 = vld [vmem:[#allocation29_spill] sm:$0xff] }
 0x873   : > { %v1422_v10 = vpop.permute.xlu1 %1421 }
 0x874   : > { %v1424_v18 = vmul.f32 %v1422_v10, %v4015_v27  ;;  %v1425_v2 = vmul.f32 %v1422_v10, %v4016_v46  ;;  %v1426_v9 = vmul.f32 %v1422_v10, %v4017_v23  ;;  %v1427_v7 = vmul.f32 %v1422_v10, %v4018_v12 }
 0x875   : > { %v1428_v24 = vmul.f32 %v1422_v10, %v4023_v57  ;;  %v1429_v3 = vmul.f32 %v1422_v10, %v4024_v44  ;;  %v1430_v60 = vmul.f32 %v1422_v10, %v4027_v62  ;;  %v1431_v55 = vmul.f32 %v1422_v10, %v4028_v58  ;;  %v4036_v57 = vld [vmem:[#allocation30_spill] sm:$0xff] }
 0x878   : > { %v1434_v26 = vpop.permute.xlu1 %1433 }
 0x879   : > { %v1436_v6 = vmul.f32 %v1434_v26, %v4011_v19  ;;  %v1437_v33 = vmul.f32 %v1434_v26, %v4012_v30  ;;  %v1438_v17 = vmul.f32 %v1434_v26, %v4013_v38  ;;  %v1439_v45 = vmul.f32 %v1434_v26, %v4014_v41  ;;  %v4029_v19 = vld [vmem:[#allocation22_spill] sm:$0xff]  ;;  %v4030_v38 = vld [vmem:[#allocation28_spill] sm:$0xff] }
 0x87a   : > { %v1440_v15 = vmul.f32 %v1434_v26, %v4025_v0  ;;  %v1441_v56 = vmul.f32 %v1434_v26, %v4026_v53  ;;  %v1442_v30 = vmul.f32 %v1434_v26, %v4029_v19  ;;  %v1443_v41 = vmul.f32 %v1434_v26, %v4030_v38  ;;  %v4039_v53 = vld [vmem:[#allocation33_spill] sm:$0xff] }
 0x87b   : > { %v1444_v22 = vadd.f32 %v1436_v6, %v1424_v18  ;;  %v1445_v1 = vadd.f32 %v1437_v33, %v1425_v2  ;;  %v1446_v61 = vadd.f32 %v1438_v17, %v1426_v9  ;;  %v1447_v5 = vadd.f32 %v1439_v45, %v1427_v7  ;;  %v4032_v6 = vld [vmem:[#allocation16_spill] sm:$0xff]  ;;  %v4035_v7 = vld [vmem:[#allocation25_spill] sm:$0xff] }
 0x87c   : > { %v4033_v17 = vld [vmem:[#allocation12_spill] sm:$0xff]  ;;  %v1448_v9 = vadd.f32 %v1440_v15, %v1428_v24  ;;  %v1449_v10 = vadd.f32 %v1441_v56, %v1429_v3 }
 0x87d   : > { %v1454_v25 = vpop.permute.xlu1 %1453  ;;  %v4034_v18 = vld [vmem:[#allocation20_spill] sm:$0xff] }
 0x87e   : > { %v1456_v4 = vmul.f32 %v1454_v25, %v4019_v47  ;;  %v1457_v20 = vmul.f32 %v1454_v25, %v4020_v32  ;;  %v1458_v51 = vmul.f32 %v1454_v25, %v4021_v49  ;;  %v1459_v54 = vmul.f32 %v1454_v25, %v4022_v37  ;;  %v4031_v32 = vld [vmem:[#allocation8_spill] sm:$0xff] }
 0x87f   : > { %v1460_v37 = vmul.f32 %v1454_v25, %v4035_v7  ;;  %v1461_v26 = vmul.f32 %v1454_v25, %v4036_v57  ;;  %v4038_v3 = vld [vmem:[#allocation32_spill] sm:$0xff]  ;;  %v1462_v56 = vmul.f32 %v1454_v25, %v4039_v53 }
 0x880   : > { %v1464_v27 = vadd.f32 %v1456_v4, %v1444_v22  ;;  %v1465_v46 = vadd.f32 %v1457_v20, %v1445_v1  ;;  %v1466_v23 = vadd.f32 %v1458_v51, %v1446_v61  ;;  %v1467_v12 = vadd.f32 %v1459_v54, %v1447_v5  ;;  %v4037_v54 = vld [vmem:[#allocation31_spill] sm:$0xff]  ;;  %v4040_v22 = vld [vmem:[#allocation34_spill] sm:$0xff] }
 0x881   : > { %v1463_v1 = vmul.f32 %v1454_v25, %v4040_v22  ;;  %v1468_v19 = vadd.f32 %v1460_v37, %v1448_v9  ;;  %v1469_v38 = vadd.f32 %v1461_v26, %v1449_v10 }
 0x882   : > { %v1474_v47 = vpop.permute.xlu1 %1473 }
 0x883   : > { %v1476_v49 = vmul.f32 %v1474_v47, %v4031_v32  ;;  %v1477_v33 = vmul.f32 %v1474_v47, %v4032_v6  ;;  %v1478_v45 = vmul.f32 %v1474_v47, %v4033_v17  ;;  %v1479_v2 = vmul.f32 %v1474_v47, %v4034_v18 }
 0x884   : > { %v1480_v24 = vmul.f32 %v1474_v47, %v4037_v54  ;;  %v1481_v0 = vmul.f32 %v1474_v47, %v4038_v3 }
 0x885   : > { %v1484_v4 = vadd.f32 %v1476_v49, %v1464_v27  ;;  %v1485_v20 = vadd.f32 %v1477_v33, %v1465_v46  ;;  %v1486_v44 = vadd.f32 %v1478_v45, %v1466_v23  ;;  %v1487_v51 = vadd.f32 %v1479_v2, %v1467_v12  ;;  %v4041_v12 = vld [vmem:[#allocation35_spill] sm:$0xff]  ;;  %v4042_v49 = vld [vmem:[#allocation36_spill] sm:$0xff] }
 0x886   : > { %v1986_v15 = vpop.permute.xlu1 %1985  ;;  %v1488_v25 = vadd.f32 %v1480_v24, %v1468_v19  ;;  %v1489_v23 = vadd.f32 %v1481_v0, %v1469_v38  ;;  %v1482_v32 = vmul.f32 %v1474_v47, %v4041_v12 }
 0x887   : > { %v2063_v61 = vmul.f32 %v2055_v48, %v1484_v4  ;;  %v2064_v5 = vmul.f32 %v2056_v13, %v1485_v20  ;;  %v2065_v62 = vmul.f32 %v2057_v59, %v1486_v44  ;;  %v2066_v58 = vmul.f32 %v2058_v8, %v1487_v51 }
 0x888   : > { %v1996_v27 = vsel %vm1993_vm0, %v1986_v15, %v3701_v36  ;;  %v1997_v46 = vsel %vm1993_vm0, %v4004_v63, %v1986_v15  ;;  %v1450_v8 = vadd.f32 %v1442_v30, %v1430_v60  ;;  %v1451_v48 = vadd.f32 %v1443_v41, %v1431_v55 }
 0x889   : > { %2071 = vst [vmem:[%s3840_s19] sm:$0xff] %v2063_v61  ;;  %2072 = vst [vmem:[%s3840_s19 + $0x8] sm:$0xff] %v2064_v5  ;;  %v2051_v13 = vmul.f32 %v2026_v50, %v1997_v46  ;;  %v2052_v59 = vmul.f32 %v2030_v52, %v1996_v27  ;;  %v1483_v63 = vmul.f32 %v1474_v47, %v4042_v49 }
 0x88a   : > { %2073 = vst [vmem:[%s3840_s19 + $0x10] sm:$0xff] %v2065_v62  ;;  %2074 = vst [vmem:[%s3840_s19 + $0x18] sm:$0xff] %v2066_v58  ;;  %v1990_v6 = vpop.permute.xlu1 %1989  ;;  %v1470_v52 = vadd.f32 %v1462_v56, %v1450_v8  ;;  %v1471_v60 = vadd.f32 %v1463_v1, %v1451_v48 }
 0x88b   : > { %v2059_v33 = vadd.f32 %v2051_v13, %v3801_v21  ;;  %v2060_v28 = vadd.f32 %v2052_v59, %v3803_v31  ;;  %v1994_v39 = vsel %vm1993_vm0, %v1990_v6, %v3724_v34  ;;  %v1995_v50 = vsel %vm1993_vm0, %v3701_v36, %v1990_v6 }
 0x88c   : > { %v2053_v55 = vmul.f32 %v2034_v40, %v1995_v50  ;;  %v2054_v21 = vmul.f32 %v2038_v14, %v1994_v39  ;;  %v1490_v41 = vadd.f32 %v1482_v32, %v1470_v52  ;;  %v1491_v34 = vadd.f32 %v1483_v63, %v1471_v60 }
 0x88d   : > { %v2067_v31 = vmul.f32 %v2059_v33, %v1488_v25  ;;  %v2068_v30 = vmul.f32 %v2060_v28, %v1489_v23 }
 0x88e   : > { %v2061_v47 = vadd.f32 %v2053_v55, %v3805_v16  ;;  %v2062_v35 = vadd.f32 %v2054_v21, %v3807_v11 }
 0x88f   : > { %2075 = vst [vmem:[%s3840_s19 + $0x20] sm:$0xff] %v2067_v31  ;;  %2076 = vst [vmem:[%s3840_s19 + $0x28] sm:$0xff] %v2068_v30 }
 0x890   : > { %v2069_v36 = vmul.f32 %v2061_v47, %v1490_v41  ;;  %v2070_v17 = vmul.f32 %v2062_v35, %v1491_v34 }
 0x892   : > { %2077 = vst [vmem:[%s3840_s19 + $0x30] sm:$0xff] %v2069_v36  ;;  %2078 = vst [vmem:[%s3840_s19 + $0x38] sm:$0xff] %v2070_v17 }
 0x893 PF: > { %p2430_p5 = scmp.ge.s32.totalorder %s2562_s24, 2  ;;  %s2113_s13 = sand.u32 1, %s2550_s21  }
 0x894   : > { %s2114_s15 = scalar_lea.sflag [#allocation3], %s2113_s13 }
 0x895   : > { %p2427_p1 = pnand %p2430_p5, %p2658_p6 }
 0x897   : > { %2545 = dma.done.wait (!%p2427_p1), %s2114_s15, 128  }
 0x898   : > { %2547 = vsyncadd (!%p2427_p1), %s2114_s15, 4294967168  ;;  %p17_p2 = scmp.ge.s32.totalorder %s2641_s27, 6   ;;  %s4043_s21 = smov %s2554_s22 }
 0x899   : > { %s4044_s22 = smov %s2558_s23  ;;  %s4045_s23 = smov %s2652_s30 }
 0x89a   : > { %s4046_s24 = smov %s2641_s27  ;;  %19 = sbr.rel (!%p17_p2) target bundleno = 3 (0x3), region = 101 }
 0x8a1   :  { %2127 = vsyncpa [#allocation3], 1 }
 0x8a2   :  { %2129 = vsyncpa [#allocation3 + $0x1], 1 }

</bundles_post_ra>
